<compile_context>
chip_gen: v7x
topology: tpu7x:2x2x1
jax: 0.10.0
libtpu: 0.0.40
codegen_flags: <defaults>
</compile_context>

<pallas_src>
import functools

import jax
import jax.numpy as jnp
from jax.experimental import pallas as pl
from jax.experimental.pallas import tpu as pltpu


def _num_tensorcores() -> int:
    """Best-effort TensorCores-per-chip (2 on v7x, 1 on v5e/v6e)."""
    try:
        info = pltpu.get_tpu_info()
        for attr in ("num_tensorcores", "tensorcores_per_chip", "num_cores",
                     "cores_per_chip", "num_tensor_cores"):
            n = getattr(info, attr, None)
            if isinstance(n, int) and n > 0:
                return int(n)
    except Exception:
        pass
    try:
        kind = jax.devices()[0].device_kind.lower()
        if "v7" in kind:
            return 2
    except Exception:
        pass
    return 1


def _vmem_capacity_bytes() -> int:
    try:
        cap = int(pltpu.get_tpu_info().vmem_capacity_bytes)
        if cap > 0:
            return cap
    except Exception:
        pass
    return 64 * 1024 * 1024  # conservative fallback: v7x per-TC VMEM


def _round_up(n: int, m: int) -> int:
    return ((n + m - 1) // m) * m


def _pick_tk(K: int, TH: int, w1_budget_bytes: int) -> int:
    """Largest divisor of K that is a multiple of 128 and whose double-buffered
    bf16 (TK, TH) W1 tile fits within w1_budget_bytes."""
    assert K % 128 == 0, "K = 128*F*F must be a multiple of 128"
    cap_elems = max(128, (w1_budget_bytes // (2 * 2)) // TH // 128 * 128)
    n = 1
    while K // n >= 128:
        d = K // n
        if K % n == 0 and d % 128 == 0 and d <= cap_elems:
            return d
        n += 1
    return 128


def _bbox_head_kernel(x_ref, w1_ref, b1_ref, w2_ref, b2_ref, o_ref, acc_ref,
                      *, n_k_tiles: int, tk: int):
    # grid = (NB, NH, NK)
    # x_ref:  (TB, K)    f32   (resident per batch tile; cast in-kernel)
    # w1_ref: (TK, TH)   bf16  (leading NH dim squeezed)
    # b1_ref: (1, TH)    f32
    # w2_ref: (TH, O)    bf16
    # b2_ref: (1, O)     f32
    # o_ref:  (TB, O)    f32   (partial output for this H tile)
    # acc_ref:(TB, TH)   f32   VMEM scratch accumulator
    h = pl.program_id(1)
    k = pl.program_id(2)

    @pl.when(k == 0)
    def _init():
        acc_ref[...] = jnp.zeros_like(acc_ref)

    if n_k_tiles == 1:
        xk = x_ref[...]
    else:
        k_start = pl.multiple_of(k * tk, 128)
        xk = x_ref[:, pl.ds(k_start, tk)]

    acc_ref[...] += jnp.dot(
        xk.astype(w1_ref.dtype), w1_ref[...], preferred_element_type=jnp.float32
    )

    @pl.when(k == n_k_tiles - 1)
    def _finalize():
        hidden = jnp.maximum(acc_ref[...] + b1_ref[...], 0.0)       # bias + ReLU
        y = jnp.dot(hidden.astype(w2_ref.dtype), w2_ref[...],
                    preferred_element_type=jnp.float32)
        # Add the second-layer bias exactly once (on the h == 0 partial).
        y = y + b2_ref[...] * (h == 0).astype(jnp.float32)
        o_ref[...] = y.astype(o_ref.dtype)


def prepare_bbox_head_params(w1, b1, w2, b2, num_h_tiles=None):
    """One-time conversion from PyTorch Linear layout to the kernel layout.

    w1: (512, 128*F*F), b1: (512,), w2: (num_classes*4, 512), b2: (num_classes*4,)
    Returns:
      w1_p: (NH, K, TH) bf16   (contiguous per-H-tile slabs)
      b1_p: (NH, 1, TH) f32
      w2_p: (NH, TH, O) bf16
      b2_p: (1, O)      f32
    """
    w1 = jnp.asarray(w1, jnp.float32)
    b1 = jnp.asarray(b1, jnp.float32)
    w2 = jnp.asarray(w2, jnp.float32)
    b2 = jnp.asarray(b2, jnp.float32)
    H, K = w1.shape
    O = w2.shape[0]
    assert w2.shape == (O, H) and b1.shape == (H,) and b2.shape == (O,)

    if num_h_tiles is None:
        nc = _num_tensorcores()
        num_h_tiles = nc if (nc > 1 and H % (nc * 128) == 0) else 1
    NH = int(num_h_tiles)
    TH = H // NH

    w1_p = w1.T.reshape(K, NH, TH).transpose(1, 0, 2).astype(jnp.bfloat16)  # (NH,K,TH)
    b1_p = b1.reshape(NH, 1, TH)                                            # (NH,1,TH)
    w2_p = w2.T.reshape(NH, TH, O).astype(jnp.bfloat16)                     # (NH,TH,O)
    b2_p = b2.reshape(1, O)                                                 # (1,O)
    return w1_p, b1_p, w2_p, b2_p


@jax.jit
def bbox_head_forward(x_nchw, w1_p, b1_p, w2_p, b2_p):
    """x_nchw: (B, 128, F, F). Params in the prepared layout (see above)."""
    B = x_nchw.shape[0]
    K = x_nchw.shape[1] * x_nchw.shape[2] * x_nchw.shape[3]
    NH, K_w, TH = w1_p.shape
    O = w2_p.shape[2]
    H = NH * TH
    assert K_w == K, (K_w, K)

    # Row-major flatten == torch .view on a contiguous NCHW tensor.
    x2d = x_nchw.reshape(B, K)  # stays f32; cast to bf16 happens in-kernel.

    # Batch tiling (only kicks in for large RoI batches).
    TB = B
    for cand in (256, 128):
        if B % cand == 0:
            TB = cand
            break
    NB = B // TB

    vmem_cap = _vmem_capacity_bytes()
    TK = _pick_tk(K, TH, w1_budget_bytes=vmem_cap // 4)
    NK = K // TK

    # Trace-time VMEM estimate (with (8,128) padding; inputs double-buffered).
    est_vmem = (
        2 * TK * _round_up(TH, 128) * 2                       # W1 tiles (bf16)
        + 2 * _round_up(TB, 8) * K * 4                        # resident x (f32)
        + 2 * _round_up(TH, 8) * _round_up(O, 128) * 2        # W2
        + 2 * 8 * _round_up(TH, 128) * 4                      # b1
        + 2 * 8 * _round_up(O, 128) * 4                       # b2
        + 2 * _round_up(TB, 8) * _round_up(O, 128) * 4        # output
        + _round_up(TB, 8) * _round_up(TH, 128) * 4           # acc scratch
    )
    vmem_limit = int(min(vmem_cap, max(32 * 1024 * 1024, est_vmem + 8 * 1024 * 1024)))

    cost = pl.CostEstimate(
        flops=2 * B * K * H + 2 * B * H * O,
        transcendentals=0,
        bytes_accessed=(
            B * K * 4              # x (f32, fetched once per batch tile)
            + NB * K * H * 2       # W1 stream (dominant), restreamed per batch tile
            + NB * H * O * 2       # W2
            + NB * H * 4           # b1
            + O * 4                # b2
            + NH * B * O * 4       # partial outputs
        ),
    )

    w1_spec_kwargs = {}
    if NK > 2:
        # Only matters in the many-K-tiles regime; NK is 1 for typical F.
        w1_spec_kwargs["pipeline_mode"] = pl.Buffered(3)

    kernel = functools.partial(_bbox_head_kernel, n_k_tiles=NK, tk=TK)

    partial_out = pl.pallas_call(
        kernel,
        out_shape=jax.ShapeDtypeStruct((NH, B, O), jnp.float32),
        grid_spec=pltpu.PrefetchScalarGridSpec(
            num_scalar_prefetch=0,
            grid=(NB, NH, NK),
            in_specs=[
                pl.BlockSpec((TB, K), lambda b, h, k: (b, 0)),            # x (resident)
                pl.BlockSpec((None, TK, TH), lambda b, h, k: (h, k, 0),   # W1
                             **w1_spec_kwargs),
                pl.BlockSpec((None, 1, TH), lambda b, h, k: (h, 0, 0)),   # b1
                pl.BlockSpec((None, TH, O), lambda b, h, k: (h, 0, 0)),   # W2
                pl.BlockSpec((1, O), lambda b, h, k: (0, 0)),             # b2
            ],
            out_specs=pl.BlockSpec((None, TB, O), lambda b, h, k: (h, b, 0)),
            scratch_shapes=[pltpu.VMEM((TB, TH), jnp.float32)],
        ),
        compiler_params=pltpu.CompilerParams(
            dimension_semantics=("parallel", "parallel", "arbitrary"),
            vmem_limit_bytes=vmem_limit,
        ),
        cost_estimate=cost,
    )(x2d, w1_p, b1_p, w2_p, b2_p)

    if NH == 1:
        return partial_out[0]
    # ReLU is elementwise in H, so per-H-tile second-matmul partials sum exactly.
    return partial_out.sum(axis=0)


if __name__ == "__main__":
    # Small shapes consistent with the module: in_features=4 (spatial), num_classes=2.
    B = 2
    in_features = 4
    num_classes = 2
    K = 128 * in_features * in_features        # 2048
    H = 512
    O = num_classes * 4                        # 8

    key = jax.random.PRNGKey(0)
    kx, kw1, kb1, kw2, kb2 = jax.random.split(key, 5)

    x = jax.random.normal(kx, (B, 128, in_features, in_features), dtype=jnp.float32)
    # Deterministic synthetic parameters (PyTorch Linear layout: (out, in)).
    w1 = jax.random.normal(kw1, (H, K), dtype=jnp.float32) * 0.02
    b1 = jax.random.normal(kb1, (H,), dtype=jnp.float32) * 0.02
    w2 = jax.random.normal(kw2, (O, H), dtype=jnp.float32) * 0.02
    b2 = jax.random.normal(kb2, (O,), dtype=jnp.float32) * 0.02

    # One-time parameter prep (transpose + bf16 cast + H-tile layout), off the hot path.
    w1_p, b1_p, w2_p, b2_p = prepare_bbox_head_params(w1, b1, w2, b2)

    out = bbox_head_forward(x, w1_p, b1_p, w2_p, b2_p)
    out = jax.block_until_ready(out)
    assert out.shape == (B, O), out.shape

    # Reference 1: matched precision (bf16 weights/activations, f32 accumulate).
    x2d = x.reshape(B, K)
    x_bf = x2d.astype(jnp.bfloat16).astype(jnp.float32)
    w1_bf = w1.astype(jnp.bfloat16).astype(jnp.float32)
    w2_bf = w2.astype(jnp.bfloat16).astype(jnp.float32)
    h_ref = jnp.maximum(x_bf @ w1_bf.T + b1, 0.0)
    ref_bf = h_ref.astype(jnp.bfloat16).astype(jnp.float32) @ w2_bf.T + b2
    assert jnp.allclose(out, ref_bf, atol=5e-3, rtol=5e-3), "mismatch vs bf16 reference"

    # Reference 2: pure f32 math, loose tolerance (bf16 weight quantization).
    ref_f32 = jnp.maximum(x2d @ w1.T + b1, 0.0) @ w2.T + b2
    assert jnp.allclose(out, ref_f32, atol=5e-2, rtol=5e-2), "mismatch vs f32 reference"

    print("KERNEL_OK")
</pallas_src>

<mosaic_0001>
module attributes {stable_mosaic.version = 11 : i64} {
  func.func @_bbox_head_kernel(%arg0: i32, %arg1: i32, %arg2: i32, %arg3: memref<2x2048xf32, #tpu.memory_space<vmem>>, %arg4: memref<1x2048x512xbf16, #tpu.memory_space<vmem>>, %arg5: memref<1x1x512xf32, #tpu.memory_space<vmem>>, %arg6: memref<1x512x8xbf16, #tpu.memory_space<vmem>>, %arg7: memref<1x8xf32, #tpu.memory_space<vmem>>, %arg8: memref<1x2x8xf32, #tpu.memory_space<vmem>>, %arg9: memref<2x512xf32, #tpu.memory_space<vmem>>) attributes {dimension_semantics = [#tpu.dimension_semantics<parallel>, #tpu.dimension_semantics<parallel>, #tpu.dimension_semantics<arbitrary>], iteration_bounds = array<i64: 1, 1, 1>, scalar_prefetch = 0 : i64, scratch_operands = 1 : i64, tpu.core_type = #tpu.core_type<tc>, window_params = [{transform_indices = @transform_0, window_bounds = array<i64: 2, 2048>}, {transform_indices = @transform_1, window_bounds = array<i64: 1, 2048, 512>}, {transform_indices = @transform_2, window_bounds = array<i64: 1, 1, 512>}, {transform_indices = @transform_3, window_bounds = array<i64: 1, 512, 8>}, {pipeline_mode = #tpu.pipeline_mode<synchronous>, transform_indices = @transform_4, window_bounds = array<i64: 1, 8>}, {transform_indices = @transform_5, window_bounds = array<i64: 1, 2, 8>}]} {
    %c0_i32 = arith.constant 0 : i32
    %0 = arith.cmpi eq, %arg2, %c0_i32 : i32
    %1 = arith.extui %0 : i1 to i32
    %c0_i32_0 = arith.constant 0 : i32
    %2 = arith.cmpi ne, %1, %c0_i32_0 : i32
    scf.if %2 {
      %cst_11 = arith.constant 0.000000e+00 : f32
      %14 = vector.broadcast %cst_11 : f32 to vector<2x512xf32>
      %c0_12 = arith.constant 0 : index
      %c0_13 = arith.constant 0 : index
      %15 = vector.load %arg9[%c0_12, %c0_13] : memref<2x512xf32, #tpu.memory_space<vmem>>, vector<2x512xf32>
      tpu.vector_store %arg9[%c0_12, %c0_13], %14 {strides = array<i32>} : memref<2x512xf32, #tpu.memory_space<vmem>>, vector<2x512xf32>,
    } else {
    }
    %c0 = arith.constant 0 : index
    %c0_1 = arith.constant 0 : index
    %3 = vector.load %arg3[%c0, %c0_1] : memref<2x2048xf32, #tpu.memory_space<vmem>>, vector<2x2048xf32>
    %c0_2 = arith.constant 0 : index
    %c0_3 = arith.constant 0 : index
    %4 = vector.load %arg9[%c0_2, %c0_3] : memref<2x512xf32, #tpu.memory_space<vmem>>, vector<2x512xf32>
    %5 = arith.truncf %3 : vector<2x2048xf32> to vector<2x2048xbf16>
    %c0_4 = arith.constant 0 : index
    %c0_5 = arith.constant 0 : index
    %c0_6 = arith.constant 0 : index
    %6 = vector.load %arg4[%c0_4, %c0_5, %c0_6] : memref<1x2048x512xbf16, #tpu.memory_space<vmem>>, vector<1x2048x512xbf16>
    %7 = vector.shape_cast %6 : vector<1x2048x512xbf16> to vector<2048x512xbf16>
    %cst = arith.constant dense<0.000000e+00> : vector<2x512xf32>
    %8 = tpu.matmul %5, %7, %cst {dimension_numbers = #tpu.dot_dimension_numbers<[1], [0], [0], [1], [0, 0, 1, 1], [], []>} : vector<2x2048xbf16>, vector<2048x512xbf16>, vector<2x512xf32> -> vector<2x512xf32>
    %9 = arith.addf %4, %8 : vector<2x512xf32>
    %c0_7 = arith.constant 0 : index
    %c0_8 = arith.constant 0 : index
    %10 = vector.load %arg9[%c0_7, %c0_8] : memref<2x512xf32, #tpu.memory_space<vmem>>, vector<2x512xf32>
    tpu.vector_store %arg9[%c0_7, %c0_8], %9 {strides = array<i32>} : memref<2x512xf32, #tpu.memory_space<vmem>>, vector<2x512xf32>,
    %c0_i32_9 = arith.constant 0 : i32
    %11 = arith.cmpi eq, %arg2, %c0_i32_9 : i32
    %12 = arith.extui %11 : i1 to i32
    %c0_i32_10 = arith.constant 0 : i32
    %13 = arith.cmpi ne, %12, %c0_i32_10 : i32
    scf.if %13 {
      %c0_11 = arith.constant 0 : index
      %c0_12 = arith.constant 0 : index
      %14 = vector.load %arg9[%c0_11, %c0_12] : memref<2x512xf32, #tpu.memory_space<vmem>>, vector<2x512xf32>
      %c0_13 = arith.constant 0 : index
      %c0_14 = arith.constant 0 : index
      %c0_15 = arith.constant 0 : index
      %15 = vector.load %arg5[%c0_13, %c0_14, %c0_15] : memref<1x1x512xf32, #tpu.memory_space<vmem>>, vector<1x1x512xf32>
      %16 = vector.shape_cast %15 : vector<1x1x512xf32> to vector<1x512xf32>
      %17 = vector.broadcast %16 : vector<1x512xf32> to vector<2x512xf32>
      %18 = arith.addf %14, %17 : vector<2x512xf32>
      %cst_16 = arith.constant 0.000000e+00 : f32
      %19 = vector.broadcast %cst_16 : f32 to vector<2x512xf32>
      %20 = arith.maximumf %18, %19 : vector<2x512xf32>
      %21 = arith.truncf %20 : vector<2x512xf32> to vector<2x512xbf16>
      %c0_17 = arith.constant 0 : index
      %c0_18 = arith.constant 0 : index
      %c0_19 = arith.constant 0 : index
      %22 = vector.load %arg6[%c0_17, %c0_18, %c0_19] : memref<1x512x8xbf16, #tpu.memory_space<vmem>>, vector<1x512x8xbf16>
      %23 = vector.shape_cast %22 : vector<1x512x8xbf16> to vector<512x8xbf16>
      %cst_20 = arith.constant dense<0.000000e+00> : vector<2x8xf32>
      %24 = tpu.matmul %21, %23, %cst_20 {dimension_numbers = #tpu.dot_dimension_numbers<[1], [0], [0], [1], [0, 0, 1, 1], [], []>} : vector<2x512xbf16>, vector<512x8xbf16>, vector<2x8xf32> -> vector<2x8xf32>
      %c0_21 = arith.constant 0 : index
      %c0_22 = arith.constant 0 : index
      %25 = vector.load %arg7[%c0_21, %c0_22] : memref<1x8xf32, #tpu.memory_space<vmem>>, vector<1x8xf32>
      %c0_i32_23 = arith.constant 0 : i32
      %26 = arith.cmpi eq, %arg1, %c0_i32_23 : i32
      %27 = arith.extui %26 : i1 to i32
      %28 = arith.sitofp %27 : i32 to f32
      %29 = vector.broadcast %28 : f32 to vector<1x8xf32>
      %30 = arith.mulf %25, %29 : vector<1x8xf32>
      %31 = vector.broadcast %30 : vector<1x8xf32> to vector<2x8xf32>
      %32 = arith.addf %24, %31 : vector<2x8xf32>
      %c0_24 = arith.constant 0 : index
      %c0_25 = arith.constant 0 : index
      %c0_26 = arith.constant 0 : index
      %33 = vector.load %arg8[%c0_24, %c0_25, %c0_26] : memref<1x2x8xf32, #tpu.memory_space<vmem>>, vector<1x2x8xf32>
      %34 = vector.shape_cast %33 : vector<1x2x8xf32> to vector<2x8xf32>
      %35 = vector.shape_cast %32 : vector<2x8xf32> to vector<1x2x8xf32>
      tpu.vector_store %arg8[%c0_24, %c0_25, %c0_26], %35 {strides = array<i32>} : memref<1x2x8xf32, #tpu.memory_space<vmem>>, vector<1x2x8xf32>,
    } else {
    }
    return
  }
  func.func @transform_0(%arg0: i32, %arg1: i32, %arg2: i32) -> (i32, i32) {
    %c0_i32 = arith.constant 0 : i32
    %c0_i32_0 = arith.constant 0 : i32
    return %arg0, %c0_i32 : i32, i32
  }
  func.func @transform_1(%arg0: i32, %arg1: i32, %arg2: i32) -> (i32, i32, i32) {
    %c0_i32 = arith.constant 0 : i32
    %c0_i32_0 = arith.constant 0 : i32
    return %arg1, %arg2, %c0_i32 : i32, i32, i32
  }
  func.func @transform_2(%arg0: i32, %arg1: i32, %arg2: i32) -> (i32, i32, i32) {
    %c0_i32 = arith.constant 0 : i32
    %c0_i32_0 = arith.constant 0 : i32
    %c0_i32_1 = arith.constant 0 : i32
    return %arg1, %c0_i32, %c0_i32_0 : i32, i32, i32
  }
  func.func @transform_3(%arg0: i32, %arg1: i32, %arg2: i32) -> (i32, i32, i32) {
    %c0_i32 = arith.constant 0 : i32
    %c0_i32_0 = arith.constant 0 : i32
    %c0_i32_1 = arith.constant 0 : i32
    return %arg1, %c0_i32, %c0_i32_0 : i32, i32, i32
  }
  func.func @transform_4(%arg0: i32, %arg1: i32, %arg2: i32) -> (i32, i32) {
    %c0_i32 = arith.constant 0 : i32
    %c0_i32_0 = arith.constant 0 : i32
    %c0_i32_1 = arith.constant 0 : i32
    return %c0_i32, %c0_i32_0 : i32, i32
  }
  func.func @transform_5(%arg0: i32, %arg1: i32, %arg2: i32) -> (i32, i32, i32) {
    %c0_i32 = arith.constant 0 : i32
    %c0_i32_0 = arith.constant 0 : i32
    return %arg1, %arg0, %c0_i32 : i32, i32, i32
  }
}

</mosaic_0001>

<bundles_post_ra>
// kernel: bbox_head_forward.1
= control target key start
LH: loop header
LB: loop body
LE: loop exit
PB: predicated region body
PF: predicated region fallthrough
CT: control target
= control target key end

     0   :  { %10 = vsyncpa [#allocation4], 0  ;;  %s6189_s0 = inlined_call_operand.vmem [shape: f32[2,2048], index: 0, kind: input, shape index: {}]   ;;  %s6190_s1 = inlined_call_operand.hbm [shape: bf16[1,2048,512], index: 1, kind: input, shape index: {}]   ;;  %s6191_s2 = inlined_call_operand.hbm [shape: f32[1,1,512], index: 2, kind: input, shape index: {}]   ;;  %s6192_s3 = inlined_call_operand.vmem [shape: bf16[1,512,8], index: 3, kind: input, shape index: {}]   ;;  %s6193_s4 = inlined_call_operand.hbm [shape: f32[1,8], index: 4, kind: input, shape index: {}]   ;;  %s6194_s5 = inlined_call_operand.hbm [shape: f32[1,2,8], index: 5, kind: output, shape index: {}]  }
   0x1   :  { %11 = vsyncpa [#allocation7], 0 }
   0x2   :  { %12 = vsyncpa [#allocation5], 0  ;;  %s5909_s18 = smov [#allocation6]   ;;  %s5910_s20 = smov [#allocation3]  }
   0x3   :  { %s33_s19 = sshll.u32 %s5909_s18, 4  ;;  %s20_s21 = sshll.u32 %s5910_s20, 4  ;;  %s34_s19 = int_to_ptr.vmem [resolvable:$true] %s33_s19  ;;  %s5946_s21 = int_to_ptr.vmem [resolvable:$true] %s20_s21 }
   0x4   :  { %s5815_s24 = scalar_lea.hbm %s6191_s2, 64 }
   0x5   :  { %p5816_p0 = scmp.ne.s32.totalorder %s6191_s2, %s5815_s24  ;;  %p5819_p1 = scmp.lt.u32.totalorder %s5815_s24, %s6191_s2 }
   0x7   :  { %p5821_p2 = pnand %p5819_p1, %p5816_p0 }
   0x9   :  { %5824 = shalt.err (!%p5821_p2)
}
   0xa   :  { %s5825_s29 = scalar_lea.vmem %s34_s19, 64  ;;  %p5830_p4 = scmp.lt.s32.totalorder %s34_s19, %s34_s19 }
   0xb   :  { %p5826_p3 = scmp.ne.s32.totalorder %s34_s19, %s5825_s29  ;;  %p5831_p5 = scmp.lt.s32.totalorder %s5825_s29, %s5825_s29 }
   0xd   :  { %p5832_p6 = por %p5831_p5, %p5830_p4 }
   0xf   :  { %p5833_p7 = pnand %p5832_p6, %p5826_p3 }
  0x11   :  { %5836 = shalt.err (!%p5833_p7)
}
  0x12   :  { %36 = dma.hbm_to_vmem [thread:$0]  %s6191_s2, 64, %s34_s19, [#allocation7]  }
  0x13   :  { %s5837_s9 = scalar_lea.hbm %s6190_s1, 65536 }
  0x14   :  { %p5838_p8 = scmp.ne.s32.totalorder %s6190_s1, %s5837_s9  ;;  %p5841_p9 = scmp.lt.u32.totalorder %s5837_s9, %s6190_s1 }
  0x16   :  { %p5843_p10 = pnand %p5841_p9, %p5838_p8 }
  0x18   :  { %5846 = shalt.err (!%p5843_p10)
}
  0x19   :  { %s5847_s14 = scalar_lea.vmem %s5946_s21, 65536  ;;  %p5852_p12 = scmp.lt.s32.totalorder %s5946_s21, %s5946_s21 }
  0x1a   :  { %p5848_p11 = scmp.ne.s32.totalorder %s5946_s21, %s5847_s14  ;;  %p5853_p13 = scmp.lt.s32.totalorder %s5847_s14, %s5847_s14 }
  0x1c   :  { %p5854_p0 = por %p5853_p13, %p5852_p12 }
  0x1e   :  { %p5855_p1 = pnand %p5854_p0, %p5848_p11 }
  0x20   :  { %5858 = shalt.err (!%p5855_p1)
}
  0x21   :  { %s5911_s2 = smov 256   ;;  %s5912_s15 = smov 16  }
  0x22   :  { %26 = dma.hbm_to_vmem [thread:$0]  %s6190_s1, 65536, %s5946_s21, [#allocation4], %s5911_s2, %s5911_s2, %s5912_s15  }
  0x23   :  { %s5913_s18 = smov [#allocation8]   ;;  %s5859_s23 = scalar_lea.hbm %s6193_s4, 16 }
  0x24   :  { %s45_s19 = sshll.u32 %s5913_s18, 4  ;;  %p5860_p2 = scmp.ne.s32.totalorder %s6193_s4, %s5859_s23  ;;  %s46_s19 = int_to_ptr.vmem [resolvable:$true] %s45_s19 }
  0x25   :  { %p5863_p3 = scmp.lt.u32.totalorder %s5859_s23, %s6193_s4 }
  0x27   :  { %p5865_p4 = pnand %p5863_p3, %p5860_p2 }
  0x29   :  { %5868 = shalt.err (!%p5865_p4)
}
  0x2a   :  { %s5869_s28 = scalar_lea.vmem %s46_s19, 16  ;;  %s5873_s1 = scalar_lea.vmem %s46_s19, 32 }
  0x2b   :  { %p5870_p5 = scmp.ne.s32.totalorder %s46_s19, %s5869_s28  ;;  %p5874_p6 = scmp.lt.s32.totalorder %s46_s19, %s46_s19 }
  0x2c   :  { %p5875_p7 = scmp.lt.s32.totalorder %s5873_s1, %s5869_s28 }
  0x2e   :  { %p5876_p8 = por %p5875_p7, %p5874_p6 }
  0x30   :  { %p5877_p9 = pnand %p5876_p8, %p5870_p5 }
  0x32   :  { %5880 = shalt.err (!%p5877_p9)
}
  0x33   :  { %48 = dma.hbm_to_vmem [thread:$0]  %s6193_s4, 16, %s46_s19, [#allocation7]  }
  0x34   :  { %5903 = dma.done.wait [#allocation4], 65536  }
  0x35   :  { %5904 = vsyncadd [#allocation4], 4294901760 }
  0x36   :  { %5905 = dma.done.wait [#allocation7], 80  }
  0x37   :  { %5906 = vsyncadd [#allocation7], 4294967216  ;;  %v5011_v0 = vld [vmem:[#allocation3 + $0x4] ss:$16 sps:$4 sm:$0xff]   ;;  %v5013_v1 = vld [vmem:[#allocation3 + $0xc] ss:$16 sps:$4 sm:$0xff]   ;;  %v77_v38 = vlaneseq }
  0x38   :  { %3245 = vmatprep.subr.bf16.mxu0 %v5011_v0  ;;  %v5015_v2 = vld [vmem:[#allocation3] ss:$16 sps:$4 sm:$0xff]   ;;  %v5016_v3 = vld [vmem:[#allocation3 + $0x8] ss:$16 sps:$4 sm:$0xff]   ;;  %3573 = vmatprep.subr.bf16.mxu1 %v5013_v1  ;;  %v5017_v4 = vld [vmem:[#allocation3 + $0x24] ss:$16 sps:$4 sm:$0xff]  }
  0x39   :  { %3246 = vmatpush1.bf16.msra.mxu0 %v5015_v2  ;;  %3574 = vmatpush1.bf16.msra.mxu1 %v5016_v3  ;;  %v5019_v5 = vld [vmem:[#allocation3 + $0x2c] ss:$16 sps:$4 sm:$0xff]   ;;  %v5021_v6 = vld [vmem:[#allocation3 + $0x20] ss:$16 sps:$4 sm:$0xff]   ;;  %v5022_v7 = vld [vmem:[#allocation3 + $0x28] ss:$16 sps:$4 sm:$0xff]  }
  0x3a   :  { %3247 = vmatprep.subr.bf16.mxu0 %v5017_v4  ;;  %3575 = vmatprep.subr.bf16.mxu1 %v5019_v5  ;;  %v5023_v8 = vld [vmem:[#allocation3 + $0x44] ss:$16 sps:$4 sm:$0xff]   ;;  %v5025_v9 = vld [vmem:[#allocation3 + $0x4c] ss:$16 sps:$4 sm:$0xff]   ;;  %v5027_v10 = vld [vmem:[#allocation3 + $0x40] ss:$16 sps:$4 sm:$0xff]  }
  0x3b   :  { %v5028_v11 = vld [vmem:[#allocation3 + $0x48] ss:$16 sps:$4 sm:$0xff]   ;;  %v5029_v12 = vld [vmem:[#allocation3 + $0x64] ss:$16 sps:$4 sm:$0xff]   ;;  %v5031_v13 = vld [vmem:[#allocation3 + $0x6c] ss:$16 sps:$4 sm:$0xff]  }
  0x3c   :  { %v5033_v14 = vld [vmem:[#allocation3 + $0x60] ss:$16 sps:$4 sm:$0xff]   ;;  %v5034_v15 = vld [vmem:[#allocation3 + $0x68] ss:$16 sps:$4 sm:$0xff]   ;;  %v5035_v16 = vld [vmem:[#allocation3 + $0x84] ss:$16 sps:$4 sm:$0xff]  }
  0x3d   :  { %3248 = vmatpush1.bf16.msra.mxu0 %v5021_v6  ;;  %3576 = vmatpush1.bf16.msra.mxu1 %v5022_v7  ;;  %v5037_v17 = vld [vmem:[#allocation3 + $0x8c] ss:$16 sps:$4 sm:$0xff]   ;;  %v5039_v18 = vld [vmem:[#allocation3 + $0x80] ss:$16 sps:$4 sm:$0xff]   ;;  %v5040_v19 = vld [vmem:[#allocation3 + $0x88] ss:$16 sps:$4 sm:$0xff]  }
  0x3e   :  { %3249 = vmatprep.subr.bf16.mxu0 %v5023_v8  ;;  %3577 = vmatprep.subr.bf16.mxu1 %v5025_v9  ;;  %v5041_v20 = vld [vmem:[#allocation3 + $0xa4] ss:$16 sps:$4 sm:$0xff]   ;;  %v5043_v21 = vld [vmem:[#allocation3 + $0xac] ss:$16 sps:$4 sm:$0xff]   ;;  %v5045_v22 = vld [vmem:[#allocation3 + $0xa0] ss:$16 sps:$4 sm:$0xff]  }
  0x3f   :  { %v5046_v23 = vld [vmem:[#allocation3 + $0xa8] ss:$16 sps:$4 sm:$0xff]   ;;  %v5047_v24 = vld [vmem:[#allocation3 + $0xc4] ss:$16 sps:$4 sm:$0xff]   ;;  %v5049_v25 = vld [vmem:[#allocation3 + $0xcc] ss:$16 sps:$4 sm:$0xff]  }
  0x40   :  { %v5051_v26 = vld [vmem:[#allocation3 + $0xc0] ss:$16 sps:$4 sm:$0xff]   ;;  %v5052_v27 = vld [vmem:[#allocation3 + $0xc8] ss:$16 sps:$4 sm:$0xff]   ;;  %v5053_v28 = vld [vmem:[#allocation3 + $0xe4] ss:$16 sps:$4 sm:$0xff]  }
  0x41   :  { %3250 = vmatpush1.bf16.msra.mxu0 %v5027_v10  ;;  %3578 = vmatpush1.bf16.msra.mxu1 %v5028_v11  ;;  %v5055_v29 = vld [vmem:[#allocation3 + $0xec] ss:$16 sps:$4 sm:$0xff]   ;;  %v5057_v30 = vld [vmem:[#allocation3 + $0xe0] ss:$16 sps:$4 sm:$0xff]   ;;  %v5058_v31 = vld [vmem:[#allocation3 + $0xe8] ss:$16 sps:$4 sm:$0xff]  }
  0x42   :  { %3251 = vmatprep.subr.bf16.mxu0 %v5029_v12  ;;  %3579 = vmatprep.subr.bf16.mxu1 %v5031_v13  ;;  %v5059_v32 = vld [vmem:[#allocation3 + $0x104] ss:$16 sps:$4 sm:$0xff]   ;;  %v5061_v33 = vld [vmem:[#allocation3 + $0x10c] ss:$16 sps:$4 sm:$0xff]   ;;  %v5063_v34 = vld [vmem:[#allocation3 + $0x100] ss:$16 sps:$4 sm:$0xff]  }
  0x43   :  { %v5064_v35 = vld [vmem:[#allocation3 + $0x108] ss:$16 sps:$4 sm:$0xff]   ;;  %v5914_v36 = vmov 1983009808   ;;  %v5065_v39 = vld [vmem:[#allocation3 + $0x124] ss:$16 sps:$4 sm:$0xff]  }
  0x44   :  { %v75_v37 = vunpack.c.l.s4 %v5914_v36  ;;  %v5067_v40 = vld [vmem:[#allocation3 + $0x12c] ss:$16 sps:$4 sm:$0xff]   ;;  %v5069_v41 = vld [vmem:[#allocation3 + $0x120] ss:$16 sps:$4 sm:$0xff]   ;;  %v5989_v43 = vshrl.u32 %v77_v38, 7  ;;  %vm4341_vm0 = vcmask 58368  }
  0x45   :  { %3252 = vmatpush1.bf16.msra.mxu0 %v5033_v14  ;;  %3580 = vmatpush1.bf16.msra.mxu1 %v5034_v15  ;;  %v5070_v44 = vld [vmem:[#allocation3 + $0x128] ss:$16 sps:$4 sm:$0xff]   ;;  %v5071_v45 = vld [vmem:[#allocation3 + $0x144] ss:$16 sps:$4 sm:$0xff]   ;;  %v5073_v46 = vld [vmem:[#allocation3 + $0x14c] ss:$16 sps:$4 sm:$0xff]  }
  0x46   :  { %3253 = vmatprep.subr.bf16.mxu0 %v5035_v16  ;;  %3581 = vmatprep.subr.bf16.mxu1 %v5037_v17  ;;  %v76_v42 = vunpack.c.0.s8 %v75_v37  ;;  %v5075_v47 = vld [vmem:[#allocation3 + $0x140] ss:$16 sps:$4 sm:$0xff]   ;;  %v5076_v48 = vld [vmem:[#allocation3 + $0x148] ss:$16 sps:$4 sm:$0xff]   ;;  %v5077_v50 = vld [vmem:[#allocation3 + $0x164] ss:$16 sps:$4 sm:$0xff]  }
  0x47   :  { %v5079_v51 = vld [vmem:[#allocation3 + $0x16c] ss:$16 sps:$4 sm:$0xff]   ;;  %v64_v52 = vld [vmem:[%s6189_s0] sm:$0xff]  ;;  %v5082_v55 = vld [vmem:[#allocation3 + $0x168] ss:$16 sps:$4 sm:$0xff]  }
  0x48   :  { %v5992_v49 = vsub.s32 %v76_v42, %v5989_v43  ;;  %v5081_v53 = vld [vmem:[#allocation3 + $0x160] ss:$16 sps:$4 sm:$0xff]   ;;  %v5083_v56 = vld [vmem:[#allocation3 + $0x184] ss:$16 sps:$4 sm:$0xff]   ;;  %v5085_v57 = vld [vmem:[#allocation3 + $0x18c] ss:$16 sps:$4 sm:$0xff]   ;;  %v73_v4 = vcombine.high %v64_v52, %v64_v52 }
  0x49   :  { %3254 = vmatpush1.bf16.msra.mxu0 %v5039_v18  ;;  %3582 = vmatpush1.bf16.msra.mxu1 %v5040_v19  ;;  %v5087_v59 = vld [vmem:[#allocation3 + $0x180] ss:$16 sps:$4 sm:$0xff]   ;;  %v5088_v61 = vld [vmem:[#allocation3 + $0x188] ss:$16 sps:$4 sm:$0xff]   ;;  %v5089_v62 = vld [vmem:[#allocation3 + $0x1a4] ss:$16 sps:$4 sm:$0xff]  }
  0x4a   :  { %3255 = vmatprep.subr.bf16.mxu0 %v5041_v20  ;;  %3583 = vmatprep.subr.bf16.mxu1 %v5043_v21  ;;  %v80_v54 = vrot.slane %v64_v52, %v5992_v49  ;;  %v5091_v63 = vld [vmem:[#allocation3 + $0x1ac] ss:$16 sps:$4 sm:$0xff]   ;;  %v5093_v0 = vld [vmem:[#allocation3 + $0x1a0] ss:$16 sps:$4 sm:$0xff]   ;;  %v5094_v1 = vld [vmem:[#allocation3 + $0x1a8] ss:$16 sps:$4 sm:$0xff]   ;;  %v5999_v9 = vrot.slane %v73_v4, %v5992_v49 }
  0x4b   :  { %v5095_v2 = vld [vmem:[#allocation3 + $0x1c4] ss:$16 sps:$4 sm:$0xff]   ;;  %v5097_v3 = vld [vmem:[#allocation3 + $0x1cc] ss:$16 sps:$4 sm:$0xff]   ;;  %v5099_v5 = vld [vmem:[#allocation3 + $0x1c0] ss:$16 sps:$4 sm:$0xff]  }
  0x4c   :  { %v88_v58 = vcombine.high %v80_v54, %v80_v54  ;;  %v5100_v6 = vld [vmem:[#allocation3 + $0x1c8] ss:$16 sps:$4 sm:$0xff]   ;;  %v5101_v7 = vld [vmem:[#allocation3 + $0x1e4] ss:$16 sps:$4 sm:$0xff]   ;;  %v5103_v8 = vld [vmem:[#allocation3 + $0x1ec] ss:$16 sps:$4 sm:$0xff]   ;;  %v89_v14 = vcombine.high %v5999_v9, %v5999_v9  ;;  %v157_v16 = vpack.c.bf16 %v80_v54, %v80_v54 }
  0x4d   :  { %3256 = vmatpush1.bf16.msra.mxu0 %v5045_v22  ;;  %3584 = vmatpush1.bf16.msra.mxu1 %v5046_v23  ;;  %v5105_v10 = vld [vmem:[#allocation3 + $0x1e0] ss:$16 sps:$4 sm:$0xff]   ;;  %v5106_v11 = vld [vmem:[#allocation3 + $0x1e8] ss:$16 sps:$4 sm:$0xff]   ;;  %v5110_v12 = vld [vmem:[#allocation3 + $0x204] ss:$16 sps:$4 sm:$0xff]  }
  0x4e   :  { %3257 = vmatprep.subr.bf16.mxu0 %v5047_v24  ;;  %3585 = vmatprep.subr.bf16.mxu1 %v5049_v25  ;;  %v158_v60 = vpack.c.bf16 %v88_v58, %v88_v58  ;;  %v5113_v13 = vld [vmem:[#allocation3 + $0x20c] ss:$16 sps:$4 sm:$0xff]   ;;  %v5108_v15 = vld [vmem:[#allocation3 + $0x200] ss:$16 sps:$4 sm:$0xff]   ;;  %v5111_v17 = vld [vmem:[#allocation3 + $0x208] ss:$16 sps:$4 sm:$0xff]   ;;  %v160_v20 = vpack.c.bf16 %v89_v14, %v89_v14 }
  0x4f   :  { %v5116_v18 = vld [vmem:[#allocation3 + $0x224] ss:$16 sps:$4 sm:$0xff]   ;;  %v5119_v19 = vld [vmem:[#allocation3 + $0x22c] ss:$16 sps:$4 sm:$0xff]   ;;  %v5114_v21 = vld [vmem:[#allocation3 + $0x220] ss:$16 sps:$4 sm:$0xff]  }
  0x50   :  { %3277 = vmatprep.mubr.bf16.mxu0 %v158_v60  ;;  %3605 = vmatprep.mubr.bf16.mxu1 %v158_v60  ;;  %v5117_v22 = vld [vmem:[#allocation3 + $0x228] ss:$16 sps:$4 sm:$0xff]   ;;  %v5122_v23 = vld [vmem:[#allocation3 + $0x244] ss:$16 sps:$4 sm:$0xff]   ;;  %v5125_v24 = vld [vmem:[#allocation3 + $0x24c] ss:$16 sps:$4 sm:$0xff]  }
  0x51   :  { %3258 = vmatpush1.bf16.msra.mxu0 %v5051_v26  ;;  %3586 = vmatpush1.bf16.msra.mxu1 %v5052_v27  ;;  %v5120_v25 = vld [vmem:[#allocation3 + $0x240] ss:$16 sps:$4 sm:$0xff]   ;;  %v5123_v26 = vld [vmem:[#allocation3 + $0x248] ss:$16 sps:$4 sm:$0xff]   ;;  %v5128_v27 = vld [vmem:[#allocation3 + $0x264] ss:$16 sps:$4 sm:$0xff]  }
  0x52   :  { %3259 = vmatprep.subr.bf16.mxu0 %v5053_v28  ;;  %3587 = vmatprep.subr.bf16.mxu1 %v5055_v29  ;;  %v5131_v28 = vld [vmem:[#allocation3 + $0x26c] ss:$16 sps:$4 sm:$0xff]   ;;  %v5126_v29 = vld [vmem:[#allocation3 + $0x260] ss:$16 sps:$4 sm:$0xff]   ;;  %v5141_v38 = vld [vmem:[#allocation3 + $0x2a8] ss:$16 sps:$4 sm:$0xff]  }
  0x53   :  { %v5143_v36 = vld [vmem:[#allocation3 + $0x2ac] ss:$16 sps:$4 sm:$0xff]   ;;  %v5138_v37 = vld [vmem:[#allocation3 + $0x2a0] ss:$16 sps:$4 sm:$0xff]   ;;  %v5147_v42 = vld [vmem:[#allocation3 + $0x2c8] ss:$16 sps:$4 sm:$0xff]  }
  0x54   :  { %v5159_v52 = vld [vmem:[#allocation3 + $0x308] ss:$16 sps:$4 sm:$0xff]   ;;  %v5167_v54 = vld [vmem:[#allocation3 + $0x32c] ss:$16 sps:$4 sm:$0xff]   ;;  %v5200_v14 = vld [vmem:[#allocation3 + $0x3e4] ss:$16 sps:$4 sm:$0xff]  }
  0x55   :  { %3260 = vmatpush1.bf16.msra.mxu0 %v5057_v30  ;;  %3588 = vmatpush1.bf16.msra.mxu1 %v5058_v31  ;;  %v5129_v30 = vld [vmem:[#allocation3 + $0x268] ss:$16 sps:$4 sm:$0xff]   ;;  %v5134_v31 = vld [vmem:[#allocation3 + $0x284] ss:$16 sps:$4 sm:$0xff]   ;;  %v5173_v58 = vld [vmem:[#allocation3 + $0x34c] ss:$16 sps:$4 sm:$0xff]  }
  0x56   :  { %3261 = vmatprep.subr.bf16.mxu0 %v5059_v32  ;;  %3589 = vmatprep.subr.bf16.mxu1 %v5061_v33  ;;  %v5137_v32 = vld [vmem:[#allocation3 + $0x28c] ss:$16 sps:$4 sm:$0xff]   ;;  %v5132_v33 = vld [vmem:[#allocation3 + $0x280] ss:$16 sps:$4 sm:$0xff]   ;;  %v5171_v60 = vld [vmem:[#allocation3 + $0x348] ss:$16 sps:$4 sm:$0xff]  }
  0x57   :  { %v5183_v4 = vld [vmem:[#allocation3 + $0x388] ss:$16 sps:$4 sm:$0xff]  }
  0x59   :  { %3262 = vmatpush1.bf16.msra.mxu0 %v5063_v34  ;;  %3590 = vmatpush1.bf16.msra.mxu1 %v5064_v35  ;;  %v5135_v34 = vld [vmem:[#allocation3 + $0x288] ss:$16 sps:$4 sm:$0xff]   ;;  %v5140_v35 = vld [vmem:[#allocation3 + $0x2a4] ss:$16 sps:$4 sm:$0xff]  }
  0x5a   :  { %3263 = vmatprep.subr.bf16.mxu0 %v5065_v39  ;;  %3591 = vmatprep.subr.bf16.mxu1 %v5067_v40  ;;  %v5146_v39 = vld [vmem:[#allocation3 + $0x2c4] ss:$16 sps:$4 sm:$0xff]   ;;  %v5149_v40 = vld [vmem:[#allocation3 + $0x2cc] ss:$16 sps:$4 sm:$0xff]  }
  0x5d   :  { %3264 = vmatpush1.bf16.msra.mxu0 %v5069_v41  ;;  %3592 = vmatpush1.bf16.msra.mxu1 %v5070_v44  ;;  %v5144_v41 = vld [vmem:[#allocation3 + $0x2c0] ss:$16 sps:$4 sm:$0xff]   ;;  %v5152_v44 = vld [vmem:[#allocation3 + $0x2e4] ss:$16 sps:$4 sm:$0xff]  }
  0x5e   :  { %3265 = vmatprep.subr.bf16.mxu0 %v5071_v45  ;;  %3593 = vmatprep.subr.bf16.mxu1 %v5073_v46  ;;  %v5155_v45 = vld [vmem:[#allocation3 + $0x2ec] ss:$16 sps:$4 sm:$0xff]   ;;  %v5150_v46 = vld [vmem:[#allocation3 + $0x2e0] ss:$16 sps:$4 sm:$0xff]  }
  0x61   :  { %3266 = vmatpush1.bf16.msra.mxu0 %v5075_v47  ;;  %3594 = vmatpush1.bf16.msra.mxu1 %v5076_v48  ;;  %v5153_v47 = vld [vmem:[#allocation3 + $0x2e8] ss:$16 sps:$4 sm:$0xff]   ;;  %v5158_v48 = vld [vmem:[#allocation3 + $0x304] ss:$16 sps:$4 sm:$0xff]  }
  0x62   :  { %3267 = vmatprep.subr.bf16.mxu0 %v5077_v50  ;;  %3595 = vmatprep.subr.bf16.mxu1 %v5079_v51  ;;  %v5161_v50 = vld [vmem:[#allocation3 + $0x30c] ss:$16 sps:$4 sm:$0xff]   ;;  %v5156_v51 = vld [vmem:[#allocation3 + $0x300] ss:$16 sps:$4 sm:$0xff]  }
  0x65   :  { %3268 = vmatpush1.bf16.msra.mxu0 %v5081_v53  ;;  %3596 = vmatpush1.bf16.msra.mxu1 %v5082_v55  ;;  %v5164_v53 = vld [vmem:[#allocation3 + $0x324] ss:$16 sps:$4 sm:$0xff]   ;;  %v5162_v55 = vld [vmem:[#allocation3 + $0x320] ss:$16 sps:$4 sm:$0xff]  }
  0x66   :  { %3269 = vmatprep.subr.bf16.mxu0 %v5083_v56  ;;  %3597 = vmatprep.subr.bf16.mxu1 %v5085_v57  ;;  %v5165_v56 = vld [vmem:[#allocation3 + $0x328] ss:$16 sps:$4 sm:$0xff]   ;;  %v5170_v57 = vld [vmem:[#allocation3 + $0x344] ss:$16 sps:$4 sm:$0xff]  }
  0x69   :  { %3270 = vmatpush1.bf16.msra.mxu0 %v5087_v59  ;;  %3598 = vmatpush1.bf16.msra.mxu1 %v5088_v61  ;;  %v5168_v59 = vld [vmem:[#allocation3 + $0x340] ss:$16 sps:$4 sm:$0xff]   ;;  %v5176_v61 = vld [vmem:[#allocation3 + $0x364] ss:$16 sps:$4 sm:$0xff]  }
  0x6a   :  { %3271 = vmatprep.subr.bf16.mxu0 %v5089_v62  ;;  %3599 = vmatprep.subr.bf16.mxu1 %v5091_v63  ;;  %v5179_v62 = vld [vmem:[#allocation3 + $0x36c] ss:$16 sps:$4 sm:$0xff]   ;;  %v5174_v63 = vld [vmem:[#allocation3 + $0x360] ss:$16 sps:$4 sm:$0xff]  }
  0x6d   :  { %3272 = vmatpush1.bf16.msra.mxu0 %v5093_v0  ;;  %3600 = vmatpush1.bf16.msra.mxu1 %v5094_v1  ;;  %v5177_v0 = vld [vmem:[#allocation3 + $0x368] ss:$16 sps:$4 sm:$0xff]   ;;  %v5182_v1 = vld [vmem:[#allocation3 + $0x384] ss:$16 sps:$4 sm:$0xff]  }
  0x6e   :  { %3273 = vmatprep.subr.bf16.mxu0 %v5095_v2  ;;  %3601 = vmatprep.subr.bf16.mxu1 %v5097_v3  ;;  %v5185_v2 = vld [vmem:[#allocation3 + $0x38c] ss:$16 sps:$4 sm:$0xff]   ;;  %v5180_v3 = vld [vmem:[#allocation3 + $0x380] ss:$16 sps:$4 sm:$0xff]  }
  0x71   :  { %3274 = vmatpush1.bf16.msra.mxu0 %v5099_v5  ;;  %3602 = vmatpush1.bf16.msra.mxu1 %v5100_v6  ;;  %v5188_v5 = vld [vmem:[#allocation3 + $0x3a4] ss:$16 sps:$4 sm:$0xff]   ;;  %v5191_v6 = vld [vmem:[#allocation3 + $0x3ac] ss:$16 sps:$4 sm:$0xff]  }
  0x72   :  { %3275 = vmatprep.subr.bf16.mxu0 %v5101_v7  ;;  %3603 = vmatprep.subr.bf16.mxu1 %v5103_v8  ;;  %v5186_v7 = vld [vmem:[#allocation3 + $0x3a0] ss:$16 sps:$4 sm:$0xff]   ;;  %v5189_v8 = vld [vmem:[#allocation3 + $0x3a8] ss:$16 sps:$4 sm:$0xff]  }
  0x75   :  { %3276 = vmatpush1.bf16.msra.mxu0 %v5105_v10  ;;  %3604 = vmatpush1.bf16.msra.mxu1 %v5106_v11  ;;  %v5194_v10 = vld [vmem:[#allocation3 + $0x3c4] ss:$16 sps:$4 sm:$0xff]   ;;  %v5197_v11 = vld [vmem:[#allocation3 + $0x3cc] ss:$16 sps:$4 sm:$0xff]  }
  0x76   :  { %3286 = vmatprep.subr.bf16.mxu0 %v5110_v12  ;;  %3614 = vmatprep.subr.bf16.mxu1 %v5113_v13  ;;  %v5192_v12 = vld [vmem:[#allocation3 + $0x3c0] ss:$16 sps:$4 sm:$0xff]   ;;  %v5195_v13 = vld [vmem:[#allocation3 + $0x3c8] ss:$16 sps:$4 sm:$0xff]  }
  0x78   :  { %3278 = vmatmul.mubr.bf16.vlgmr.msra.gmra.mrb[0].mxu0 %v157_v16  ;;  %3606 = vmatmul.mubr.bf16.vlgmr.msra.gmra.mrb[0].mxu1 %v157_v16  ;;  %v5198_v16 = vld [vmem:[#allocation3 + $0x3e0] ss:$16 sps:$4 sm:$0xff]  }
  0x79   :  { %3287 = vmatpush1.bf16.msra.mxu0 %v5108_v15  ;;  %3615 = vmatpush1.bf16.msra.mxu1 %v5111_v17  ;;  %v5203_v15 = vld [vmem:[#allocation3 + $0x3ec] ss:$16 sps:$4 sm:$0xff]   ;;  %v5201_v17 = vld [vmem:[#allocation3 + $0x3e8] ss:$16 sps:$4 sm:$0xff]  }
  0x7a   :  { %3288 = vmatprep.subr.bf16.mxu0 %v5116_v18  ;;  %3616 = vmatprep.subr.bf16.mxu1 %v5119_v19  ;;  %v5206_v18 = vld [vmem:[#allocation3 + $0x404] ss:$16 sps:$4 sm:$0xff]   ;;  %v5209_v19 = vld [vmem:[#allocation3 + $0x40c] ss:$16 sps:$4 sm:$0xff]  }
  0x7b   :  { %3318 = vmatprep.mubr.bf16.mxu0 %v160_v20  ;;  %3646 = vmatprep.mubr.bf16.mxu1 %v160_v20  ;;  %v5204_v20 = vld [vmem:[#allocation3 + $0x400] ss:$16 sps:$4 sm:$0xff]  }
  0x7d   :  { %3289 = vmatpush1.bf16.msra.mxu0 %v5114_v21  ;;  %3617 = vmatpush1.bf16.msra.mxu1 %v5117_v22  ;;  %v159_v21 = vpack.c.bf16 %v5999_v9, %v5999_v9  ;;  %v5207_v22 = vld [vmem:[#allocation3 + $0x408] ss:$16 sps:$4 sm:$0xff]  }
  0x7e   :  { %3290 = vmatprep.subr.bf16.mxu0 %v5122_v23  ;;  %3618 = vmatprep.subr.bf16.mxu1 %v5125_v24  ;;  %v6008_v23 = vld [vmem:[%s6189_s0 + $0x8] sm:$0xff]  ;;  %v5212_v24 = vld [vmem:[#allocation3 + $0x424] ss:$16 sps:$4 sm:$0xff]  }
  0x81   :  { %3291 = vmatpush1.bf16.msra.mxu0 %v5120_v25  ;;  %3619 = vmatpush1.bf16.msra.mxu1 %v5123_v26  ;;  %v5215_v25 = vld [vmem:[#allocation3 + $0x42c] ss:$16 sps:$4 sm:$0xff]   ;;  %v6012_v26 = vrot.slane %v6008_v23, %v5992_v49 }
  0x82   :  { %3292 = vmatprep.subr.bf16.mxu0 %v5128_v27  ;;  %3620 = vmatprep.subr.bf16.mxu1 %v5131_v28  ;;  %v5210_v27 = vld [vmem:[#allocation3 + $0x420] ss:$16 sps:$4 sm:$0xff]   ;;  %v5213_v28 = vld [vmem:[#allocation3 + $0x428] ss:$16 sps:$4 sm:$0xff]  }
  0x83   :  { %v105_v9 = vcombine.high %v6012_v26, %v6012_v26 }
  0x85   :  { %3293 = vmatpush1.bf16.msra.mxu0 %v5126_v29  ;;  %3621 = vmatpush1.bf16.msra.mxu1 %v5129_v30  ;;  %v5218_v29 = vld [vmem:[#allocation3 + $0x444] ss:$16 sps:$4 sm:$0xff]   ;;  %v5221_v30 = vld [vmem:[#allocation3 + $0x44c] ss:$16 sps:$4 sm:$0xff]  }
  0x86   :  { %3294 = vmatprep.subr.bf16.mxu0 %v5134_v31  ;;  %3622 = vmatprep.subr.bf16.mxu1 %v5137_v32  ;;  %v162_v31 = vpack.c.bf16 %v105_v9, %v105_v9  ;;  %v5216_v32 = vld [vmem:[#allocation3 + $0x440] ss:$16 sps:$4 sm:$0xff]  }
  0x87   :  { %v5294_v9 = vld [vmem:[#allocation3 + $0x5e0] ss:$16 sps:$4 sm:$0xff]  }
  0x89   :  { %3295 = vmatpush1.bf16.msra.mxu0 %v5132_v33  ;;  %3623 = vmatpush1.bf16.msra.mxu1 %v5135_v34  ;;  %v5219_v33 = vld [vmem:[#allocation3 + $0x448] ss:$16 sps:$4 sm:$0xff]   ;;  %v5224_v34 = vld [vmem:[#allocation3 + $0x464] ss:$16 sps:$4 sm:$0xff]  }
  0x8a   :  { %3296 = vmatprep.subr.bf16.mxu0 %v5140_v35  ;;  %3624 = vmatprep.subr.bf16.mxu1 %v5143_v36  ;;  %v5227_v35 = vld [vmem:[#allocation3 + $0x46c] ss:$16 sps:$4 sm:$0xff]   ;;  %v5222_v36 = vld [vmem:[#allocation3 + $0x460] ss:$16 sps:$4 sm:$0xff]  }
  0x8d   :  { %3297 = vmatpush1.bf16.msra.mxu0 %v5138_v37  ;;  %3625 = vmatpush1.bf16.msra.mxu1 %v5141_v38  ;;  %v5225_v37 = vld [vmem:[#allocation3 + $0x468] ss:$16 sps:$4 sm:$0xff]   ;;  %v5230_v38 = vld [vmem:[#allocation3 + $0x484] ss:$16 sps:$4 sm:$0xff]  }
  0x8e   :  { %3298 = vmatprep.subr.bf16.mxu0 %v5146_v39  ;;  %3626 = vmatprep.subr.bf16.mxu1 %v5149_v40  ;;  %v5233_v39 = vld [vmem:[#allocation3 + $0x48c] ss:$16 sps:$4 sm:$0xff]   ;;  %v5228_v40 = vld [vmem:[#allocation3 + $0x480] ss:$16 sps:$4 sm:$0xff]  }
  0x91   :  { %3299 = vmatpush1.bf16.msra.mxu0 %v5144_v41  ;;  %3627 = vmatpush1.bf16.msra.mxu1 %v5147_v42  ;;  %v5231_v41 = vld [vmem:[#allocation3 + $0x488] ss:$16 sps:$4 sm:$0xff]   ;;  %v5236_v42 = vld [vmem:[#allocation3 + $0x4a4] ss:$16 sps:$4 sm:$0xff]  }
  0x92   :  { %3300 = vmatprep.subr.bf16.mxu0 %v5152_v44  ;;  %3628 = vmatprep.subr.bf16.mxu1 %v5155_v45  ;;  %v5239_v44 = vld [vmem:[#allocation3 + $0x4ac] ss:$16 sps:$4 sm:$0xff]   ;;  %v5234_v45 = vld [vmem:[#allocation3 + $0x4a0] ss:$16 sps:$4 sm:$0xff]  }
  0x95   :  { %3301 = vmatpush1.bf16.msra.mxu0 %v5150_v46  ;;  %3629 = vmatpush1.bf16.msra.mxu1 %v5153_v47  ;;  %v5237_v46 = vld [vmem:[#allocation3 + $0x4a8] ss:$16 sps:$4 sm:$0xff]   ;;  %v5242_v47 = vld [vmem:[#allocation3 + $0x4c4] ss:$16 sps:$4 sm:$0xff]  }
  0x96   :  { %3302 = vmatprep.subr.bf16.mxu0 %v5158_v48  ;;  %3630 = vmatprep.subr.bf16.mxu1 %v5161_v50  ;;  %v5245_v48 = vld [vmem:[#allocation3 + $0x4cc] ss:$16 sps:$4 sm:$0xff]   ;;  %v5240_v50 = vld [vmem:[#allocation3 + $0x4c0] ss:$16 sps:$4 sm:$0xff]  }
  0x99   :  { %3303 = vmatpush1.bf16.msra.mxu0 %v5156_v51  ;;  %3631 = vmatpush1.bf16.msra.mxu1 %v5159_v52  ;;  %v5243_v51 = vld [vmem:[#allocation3 + $0x4c8] ss:$16 sps:$4 sm:$0xff]   ;;  %v5248_v52 = vld [vmem:[#allocation3 + $0x4e4] ss:$16 sps:$4 sm:$0xff]  }
  0x9a   :  { %3304 = vmatprep.subr.bf16.mxu0 %v5164_v53  ;;  %3632 = vmatprep.subr.bf16.mxu1 %v5167_v54  ;;  %v5251_v53 = vld [vmem:[#allocation3 + $0x4ec] ss:$16 sps:$4 sm:$0xff]   ;;  %v5246_v54 = vld [vmem:[#allocation3 + $0x4e0] ss:$16 sps:$4 sm:$0xff]  }
  0x9d   :  { %3305 = vmatpush1.bf16.msra.mxu0 %v5162_v55  ;;  %3633 = vmatpush1.bf16.msra.mxu1 %v5165_v56  ;;  %v5249_v55 = vld [vmem:[#allocation3 + $0x4e8] ss:$16 sps:$4 sm:$0xff]   ;;  %v5254_v56 = vld [vmem:[#allocation3 + $0x504] ss:$16 sps:$4 sm:$0xff]  }
  0x9e   :  { %3306 = vmatprep.subr.bf16.mxu0 %v5170_v57  ;;  %3634 = vmatprep.subr.bf16.mxu1 %v5173_v58  ;;  %v5257_v57 = vld [vmem:[#allocation3 + $0x50c] ss:$16 sps:$4 sm:$0xff]   ;;  %v5252_v58 = vld [vmem:[#allocation3 + $0x500] ss:$16 sps:$4 sm:$0xff]  }
  0xa1   :  { %3307 = vmatpush1.bf16.msra.mxu0 %v5168_v59  ;;  %3635 = vmatpush1.bf16.msra.mxu1 %v5171_v60  ;;  %v5255_v59 = vld [vmem:[#allocation3 + $0x508] ss:$16 sps:$4 sm:$0xff]   ;;  %v5260_v60 = vld [vmem:[#allocation3 + $0x524] ss:$16 sps:$4 sm:$0xff]  }
  0xa2   :  { %3308 = vmatprep.subr.bf16.mxu0 %v5176_v61  ;;  %3636 = vmatprep.subr.bf16.mxu1 %v5179_v62  ;;  %v5263_v61 = vld [vmem:[#allocation3 + $0x52c] ss:$16 sps:$4 sm:$0xff]   ;;  %v5258_v62 = vld [vmem:[#allocation3 + $0x520] ss:$16 sps:$4 sm:$0xff]  }
  0xa5   :  { %3309 = vmatpush1.bf16.msra.mxu0 %v5174_v63  ;;  %3637 = vmatpush1.bf16.msra.mxu1 %v5177_v0  ;;  %v5261_v63 = vld [vmem:[#allocation3 + $0x528] ss:$16 sps:$4 sm:$0xff]   ;;  %v5266_v0 = vld [vmem:[#allocation3 + $0x544] ss:$16 sps:$4 sm:$0xff]  }
  0xa6   :  { %3310 = vmatprep.subr.bf16.mxu0 %v5182_v1  ;;  %3638 = vmatprep.subr.bf16.mxu1 %v5185_v2  ;;  %v5269_v1 = vld [vmem:[#allocation3 + $0x54c] ss:$16 sps:$4 sm:$0xff]   ;;  %v5264_v2 = vld [vmem:[#allocation3 + $0x540] ss:$16 sps:$4 sm:$0xff]  }
  0xa9   :  { %3311 = vmatpush1.bf16.msra.mxu0 %v5180_v3  ;;  %3639 = vmatpush1.bf16.msra.mxu1 %v5183_v4  ;;  %v5267_v3 = vld [vmem:[#allocation3 + $0x548] ss:$16 sps:$4 sm:$0xff]   ;;  %v5272_v4 = vld [vmem:[#allocation3 + $0x564] ss:$16 sps:$4 sm:$0xff]  }
  0xaa   :  { %3312 = vmatprep.subr.bf16.mxu0 %v5188_v5  ;;  %3640 = vmatprep.subr.bf16.mxu1 %v5191_v6  ;;  %v5275_v5 = vld [vmem:[#allocation3 + $0x56c] ss:$16 sps:$4 sm:$0xff]   ;;  %v5270_v6 = vld [vmem:[#allocation3 + $0x560] ss:$16 sps:$4 sm:$0xff]  }
  0xad   :  { %3313 = vmatpush1.bf16.msra.mxu0 %v5186_v7  ;;  %3641 = vmatpush1.bf16.msra.mxu1 %v5189_v8  ;;  %v5273_v7 = vld [vmem:[#allocation3 + $0x568] ss:$16 sps:$4 sm:$0xff]   ;;  %v5278_v8 = vld [vmem:[#allocation3 + $0x584] ss:$16 sps:$4 sm:$0xff]  }
  0xae   :  { %3314 = vmatprep.subr.bf16.mxu0 %v5194_v10  ;;  %3642 = vmatprep.subr.bf16.mxu1 %v5197_v11  ;;  %v5281_v10 = vld [vmem:[#allocation3 + $0x58c] ss:$16 sps:$4 sm:$0xff]   ;;  %v5276_v11 = vld [vmem:[#allocation3 + $0x580] ss:$16 sps:$4 sm:$0xff]  }
  0xb1   :  { %3315 = vmatpush1.bf16.msra.mxu0 %v5192_v12  ;;  %3643 = vmatpush1.bf16.msra.mxu1 %v5195_v13  ;;  %v5279_v12 = vld [vmem:[#allocation3 + $0x588] ss:$16 sps:$4 sm:$0xff]   ;;  %v5284_v13 = vld [vmem:[#allocation3 + $0x5a4] ss:$16 sps:$4 sm:$0xff]  }
  0xb2   :  { %3316 = vmatprep.subr.bf16.mxu0 %v5200_v14  ;;  %3644 = vmatprep.subr.bf16.mxu1 %v5203_v15  ;;  %v5287_v14 = vld [vmem:[#allocation3 + $0x5ac] ss:$16 sps:$4 sm:$0xff]   ;;  %v5282_v15 = vld [vmem:[#allocation3 + $0x5a0] ss:$16 sps:$4 sm:$0xff]  }
  0xb5   :  { %3317 = vmatpush1.bf16.msra.mxu0 %v5198_v16  ;;  %3645 = vmatpush1.bf16.msra.mxu1 %v5201_v17  ;;  %v5285_v16 = vld [vmem:[#allocation3 + $0x5a8] ss:$16 sps:$4 sm:$0xff]   ;;  %v5290_v17 = vld [vmem:[#allocation3 + $0x5c4] ss:$16 sps:$4 sm:$0xff]  }
  0xb6   :  { %3327 = vmatprep.subr.bf16.mxu0 %v5206_v18  ;;  %3655 = vmatprep.subr.bf16.mxu1 %v5209_v19  ;;  %v5293_v18 = vld [vmem:[#allocation3 + $0x5cc] ss:$16 sps:$4 sm:$0xff]   ;;  %v90_v19 = vcombine.high %v6008_v23, %v6008_v23 }
  0xb8   :  { %3319 = vmatmul.mubr.bf16.vlgmr.msra.gmra.mrb[0].mxu0 %v159_v21  ;;  %3647 = vmatmul.mubr.bf16.vlgmr.msra.gmra.mrb[0].mxu1 %v159_v21  ;;  %v5291_v21 = vld [vmem:[#allocation3 + $0x5c8] ss:$16 sps:$4 sm:$0xff]  }
  0xb9   :  { %3328 = vmatpush1.bf16.msra.mxu0 %v5204_v20  ;;  %3656 = vmatpush1.bf16.msra.mxu1 %v5207_v22  ;;  %v5288_v20 = vld [vmem:[#allocation3 + $0x5c0] ss:$16 sps:$4 sm:$0xff]   ;;  %v5296_v22 = vld [vmem:[#allocation3 + $0x5e4] ss:$16 sps:$4 sm:$0xff]  }
  0xba   :  { %3329 = vmatprep.subr.bf16.mxu0 %v5212_v24  ;;  %3657 = vmatprep.subr.bf16.mxu1 %v5215_v25  ;;  %v5299_v24 = vld [vmem:[#allocation3 + $0x5ec] ss:$16 sps:$4 sm:$0xff]   ;;  %v6019_v25 = vrot.slane %v90_v19, %v5992_v49  ;;  %v5375_v19 = vld [vmem:[#allocation3 + $0x788] ss:$16 sps:$4 sm:$0xff]  }
  0xbb   :  { %3359 = vmatprep.mubr.bf16.mxu0 %v162_v31  ;;  %3687 = vmatprep.mubr.bf16.mxu1 %v162_v31  ;;  %v5300_v31 = vld [vmem:[#allocation3 + $0x600] ss:$16 sps:$4 sm:$0xff]  }
  0xbc   :  { %v106_v23 = vcombine.high %v6019_v25, %v6019_v25 }
  0xbd   :  { %3330 = vmatpush1.bf16.msra.mxu0 %v5210_v27  ;;  %3658 = vmatpush1.bf16.msra.mxu1 %v5213_v28  ;;  %v5297_v27 = vld [vmem:[#allocation3 + $0x5e8] ss:$16 sps:$4 sm:$0xff]   ;;  %v5302_v28 = vld [vmem:[#allocation3 + $0x604] ss:$16 sps:$4 sm:$0xff]  }
  0xbe   :  { %3331 = vmatprep.subr.bf16.mxu0 %v5218_v29  ;;  %3659 = vmatprep.subr.bf16.mxu1 %v5221_v30  ;;  %v5305_v29 = vld [vmem:[#allocation3 + $0x60c] ss:$16 sps:$4 sm:$0xff]   ;;  %v161_v30 = vpack.c.bf16 %v6012_v26, %v6012_v26  ;;  %v5312_v26 = vld [vmem:[#allocation3 + $0x640] ss:$16 sps:$4 sm:$0xff]  }
  0xc1   :  { %3332 = vmatpush1.bf16.msra.mxu0 %v5216_v32  ;;  %3660 = vmatpush1.bf16.msra.mxu1 %v5219_v33  ;;  %v5303_v32 = vld [vmem:[#allocation3 + $0x608] ss:$16 sps:$4 sm:$0xff]   ;;  %v5308_v33 = vld [vmem:[#allocation3 + $0x624] ss:$16 sps:$4 sm:$0xff]  }
  0xc2   :  { %3333 = vmatprep.subr.bf16.mxu0 %v5224_v34  ;;  %3661 = vmatprep.subr.bf16.mxu1 %v5227_v35  ;;  %v5311_v34 = vld [vmem:[#allocation3 + $0x62c] ss:$16 sps:$4 sm:$0xff]   ;;  %v164_v35 = vpack.c.bf16 %v106_v23, %v106_v23  ;;  %v5387_v23 = vld [vmem:[#allocation3 + $0x7c8] ss:$16 sps:$4 sm:$0xff]  }
  0xc5   :  { %3334 = vmatpush1.bf16.msra.mxu0 %v5222_v36  ;;  %3662 = vmatpush1.bf16.msra.mxu1 %v5225_v37  ;;  %v5306_v36 = vld [vmem:[#allocation3 + $0x620] ss:$16 sps:$4 sm:$0xff]   ;;  %v5309_v37 = vld [vmem:[#allocation3 + $0x628] ss:$16 sps:$4 sm:$0xff]  }
  0xc6   :  { %3335 = vmatprep.subr.bf16.mxu0 %v5230_v38  ;;  %3663 = vmatprep.subr.bf16.mxu1 %v5233_v39  ;;  %v5314_v38 = vld [vmem:[#allocation3 + $0x644] ss:$16 sps:$4 sm:$0xff]   ;;  %v5317_v39 = vld [vmem:[#allocation3 + $0x64c] ss:$16 sps:$4 sm:$0xff]  }
  0xc9   :  { %3336 = vmatpush1.bf16.msra.mxu0 %v5228_v40  ;;  %3664 = vmatpush1.bf16.msra.mxu1 %v5231_v41  ;;  %v5315_v40 = vld [vmem:[#allocation3 + $0x648] ss:$16 sps:$4 sm:$0xff]   ;;  %v5320_v41 = vld [vmem:[#allocation3 + $0x664] ss:$16 sps:$4 sm:$0xff]  }
  0xca   :  { %3337 = vmatprep.subr.bf16.mxu0 %v5236_v42  ;;  %3665 = vmatprep.subr.bf16.mxu1 %v5239_v44  ;;  %v5323_v42 = vld [vmem:[#allocation3 + $0x66c] ss:$16 sps:$4 sm:$0xff]   ;;  %v5318_v44 = vld [vmem:[#allocation3 + $0x660] ss:$16 sps:$4 sm:$0xff]  }
  0xcd   :  { %3338 = vmatpush1.bf16.msra.mxu0 %v5234_v45  ;;  %3666 = vmatpush1.bf16.msra.mxu1 %v5237_v46  ;;  %v5321_v45 = vld [vmem:[#allocation3 + $0x668] ss:$16 sps:$4 sm:$0xff]   ;;  %v5326_v46 = vld [vmem:[#allocation3 + $0x684] ss:$16 sps:$4 sm:$0xff]  }
  0xce   :  { %3339 = vmatprep.subr.bf16.mxu0 %v5242_v47  ;;  %3667 = vmatprep.subr.bf16.mxu1 %v5245_v48  ;;  %v5329_v47 = vld [vmem:[#allocation3 + $0x68c] ss:$16 sps:$4 sm:$0xff]   ;;  %v5324_v48 = vld [vmem:[#allocation3 + $0x680] ss:$16 sps:$4 sm:$0xff]  }
  0xd1   :  { %3340 = vmatpush1.bf16.msra.mxu0 %v5240_v50  ;;  %3668 = vmatpush1.bf16.msra.mxu1 %v5243_v51  ;;  %v5327_v50 = vld [vmem:[#allocation3 + $0x688] ss:$16 sps:$4 sm:$0xff]   ;;  %v5332_v51 = vld [vmem:[#allocation3 + $0x6a4] ss:$16 sps:$4 sm:$0xff]  }
  0xd2   :  { %3341 = vmatprep.subr.bf16.mxu0 %v5248_v52  ;;  %3669 = vmatprep.subr.bf16.mxu1 %v5251_v53  ;;  %v5335_v52 = vld [vmem:[#allocation3 + $0x6ac] ss:$16 sps:$4 sm:$0xff]   ;;  %v5330_v53 = vld [vmem:[#allocation3 + $0x6a0] ss:$16 sps:$4 sm:$0xff]  }
  0xd5   :  { %3342 = vmatpush1.bf16.msra.mxu0 %v5246_v54  ;;  %3670 = vmatpush1.bf16.msra.mxu1 %v5249_v55  ;;  %v5333_v54 = vld [vmem:[#allocation3 + $0x6a8] ss:$16 sps:$4 sm:$0xff]   ;;  %v5338_v55 = vld [vmem:[#allocation3 + $0x6c4] ss:$16 sps:$4 sm:$0xff]  }
  0xd6   :  { %3343 = vmatprep.subr.bf16.mxu0 %v5254_v56  ;;  %3671 = vmatprep.subr.bf16.mxu1 %v5257_v57  ;;  %v5341_v56 = vld [vmem:[#allocation3 + $0x6cc] ss:$16 sps:$4 sm:$0xff]   ;;  %v5336_v57 = vld [vmem:[#allocation3 + $0x6c0] ss:$16 sps:$4 sm:$0xff]  }
  0xd9   :  { %3344 = vmatpush1.bf16.msra.mxu0 %v5252_v58  ;;  %3672 = vmatpush1.bf16.msra.mxu1 %v5255_v59  ;;  %v5339_v58 = vld [vmem:[#allocation3 + $0x6c8] ss:$16 sps:$4 sm:$0xff]   ;;  %v5344_v59 = vld [vmem:[#allocation3 + $0x6e4] ss:$16 sps:$4 sm:$0xff]  }
  0xda   :  { %3345 = vmatprep.subr.bf16.mxu0 %v5260_v60  ;;  %3673 = vmatprep.subr.bf16.mxu1 %v5263_v61  ;;  %v5347_v60 = vld [vmem:[#allocation3 + $0x6ec] ss:$16 sps:$4 sm:$0xff]   ;;  %v5342_v61 = vld [vmem:[#allocation3 + $0x6e0] ss:$16 sps:$4 sm:$0xff]  }
  0xdd   :  { %3346 = vmatpush1.bf16.msra.mxu0 %v5258_v62  ;;  %3674 = vmatpush1.bf16.msra.mxu1 %v5261_v63  ;;  %v5345_v62 = vld [vmem:[#allocation3 + $0x6e8] ss:$16 sps:$4 sm:$0xff]   ;;  %v5350_v63 = vld [vmem:[#allocation3 + $0x704] ss:$16 sps:$4 sm:$0xff]  }
  0xde   :  { %3347 = vmatprep.subr.bf16.mxu0 %v5266_v0  ;;  %3675 = vmatprep.subr.bf16.mxu1 %v5269_v1  ;;  %v5353_v0 = vld [vmem:[#allocation3 + $0x70c] ss:$16 sps:$4 sm:$0xff]   ;;  %v5348_v1 = vld [vmem:[#allocation3 + $0x700] ss:$16 sps:$4 sm:$0xff]  }
  0xe1   :  { %3348 = vmatpush1.bf16.msra.mxu0 %v5264_v2  ;;  %3676 = vmatpush1.bf16.msra.mxu1 %v5267_v3  ;;  %v5351_v2 = vld [vmem:[#allocation3 + $0x708] ss:$16 sps:$4 sm:$0xff]   ;;  %v5356_v3 = vld [vmem:[#allocation3 + $0x724] ss:$16 sps:$4 sm:$0xff]  }
  0xe2   :  { %3349 = vmatprep.subr.bf16.mxu0 %v5272_v4  ;;  %3677 = vmatprep.subr.bf16.mxu1 %v5275_v5  ;;  %v5359_v4 = vld [vmem:[#allocation3 + $0x72c] ss:$16 sps:$4 sm:$0xff]   ;;  %v5354_v5 = vld [vmem:[#allocation3 + $0x720] ss:$16 sps:$4 sm:$0xff]  }
  0xe5   :  { %3350 = vmatpush1.bf16.msra.mxu0 %v5270_v6  ;;  %3678 = vmatpush1.bf16.msra.mxu1 %v5273_v7  ;;  %v5357_v6 = vld [vmem:[#allocation3 + $0x728] ss:$16 sps:$4 sm:$0xff]   ;;  %v5362_v7 = vld [vmem:[#allocation3 + $0x744] ss:$16 sps:$4 sm:$0xff]  }
  0xe6   :  { %3351 = vmatprep.subr.bf16.mxu0 %v5278_v8  ;;  %3679 = vmatprep.subr.bf16.mxu1 %v5281_v10  ;;  %v5365_v8 = vld [vmem:[#allocation3 + $0x74c] ss:$16 sps:$4 sm:$0xff]   ;;  %v5360_v10 = vld [vmem:[#allocation3 + $0x740] ss:$16 sps:$4 sm:$0xff]  }
  0xe9   :  { %3352 = vmatpush1.bf16.msra.mxu0 %v5276_v11  ;;  %3680 = vmatpush1.bf16.msra.mxu1 %v5279_v12  ;;  %v5363_v11 = vld [vmem:[#allocation3 + $0x748] ss:$16 sps:$4 sm:$0xff]   ;;  %v5368_v12 = vld [vmem:[#allocation3 + $0x764] ss:$16 sps:$4 sm:$0xff]  }
  0xea   :  { %3353 = vmatprep.subr.bf16.mxu0 %v5284_v13  ;;  %3681 = vmatprep.subr.bf16.mxu1 %v5287_v14  ;;  %v5371_v13 = vld [vmem:[#allocation3 + $0x76c] ss:$16 sps:$4 sm:$0xff]   ;;  %v5366_v14 = vld [vmem:[#allocation3 + $0x760] ss:$16 sps:$4 sm:$0xff]  }
  0xed   :  { %3354 = vmatpush1.bf16.msra.mxu0 %v5282_v15  ;;  %3682 = vmatpush1.bf16.msra.mxu1 %v5285_v16  ;;  %v5369_v15 = vld [vmem:[#allocation3 + $0x768] ss:$16 sps:$4 sm:$0xff]   ;;  %v5374_v16 = vld [vmem:[#allocation3 + $0x784] ss:$16 sps:$4 sm:$0xff]  }
  0xee   :  { %3355 = vmatprep.subr.bf16.mxu0 %v5290_v17  ;;  %3683 = vmatprep.subr.bf16.mxu1 %v5293_v18  ;;  %v5377_v17 = vld [vmem:[#allocation3 + $0x78c] ss:$16 sps:$4 sm:$0xff]   ;;  %v5372_v18 = vld [vmem:[#allocation3 + $0x780] ss:$16 sps:$4 sm:$0xff]  }
  0xf1   :  { %3356 = vmatpush1.bf16.msra.mxu0 %v5288_v20  ;;  %3684 = vmatpush1.bf16.msra.mxu1 %v5291_v21  ;;  %v5380_v20 = vld [vmem:[#allocation3 + $0x7a4] ss:$16 sps:$4 sm:$0xff]   ;;  %v5383_v21 = vld [vmem:[#allocation3 + $0x7ac] ss:$16 sps:$4 sm:$0xff]  }
  0xf2   :  { %3357 = vmatprep.subr.bf16.mxu0 %v5296_v22  ;;  %3685 = vmatprep.subr.bf16.mxu1 %v5299_v24  ;;  %v5378_v22 = vld [vmem:[#allocation3 + $0x7a0] ss:$16 sps:$4 sm:$0xff]   ;;  %v5381_v24 = vld [vmem:[#allocation3 + $0x7a8] ss:$16 sps:$4 sm:$0xff]  }
  0xf5   :  { %3358 = vmatpush1.bf16.msra.mxu0 %v5294_v9  ;;  %3686 = vmatpush1.bf16.msra.mxu1 %v5297_v27  ;;  %v5386_v9 = vld [vmem:[#allocation3 + $0x7c4] ss:$16 sps:$4 sm:$0xff]   ;;  %v5389_v27 = vld [vmem:[#allocation3 + $0x7cc] ss:$16 sps:$4 sm:$0xff]  }
  0xf6   :  { %3368 = vmatprep.subr.bf16.mxu0 %v5302_v28  ;;  %3696 = vmatprep.subr.bf16.mxu1 %v5305_v29  ;;  %v5384_v28 = vld [vmem:[#allocation3 + $0x7c0] ss:$16 sps:$4 sm:$0xff]  }
  0xf7   :  { %v6028_v29 = vld [vmem:[%s6189_s0 + $0x10] sm:$0xff] }
  0xf8   :  { %3360 = vmatmul.mubr.bf16.vlgmr.msra.gmra.mrb[0].mxu0 %v161_v30  ;;  %3688 = vmatmul.mubr.bf16.vlgmr.msra.gmra.mrb[0].mxu1 %v161_v30  ;;  %v5392_v30 = vld [vmem:[#allocation3 + $0x7e4] ss:$16 sps:$4 sm:$0xff]  }
  0xf9   :  { %3369 = vmatpush1.bf16.msra.mxu0 %v5300_v31  ;;  %3697 = vmatpush1.bf16.msra.mxu1 %v5303_v32  ;;  %v5395_v31 = vld [vmem:[#allocation3 + $0x7ec] ss:$16 sps:$4 sm:$0xff]   ;;  %v6032_v32 = vrot.slane %v6028_v29, %v5992_v49 }
  0xfa   :  { %3370 = vmatprep.subr.bf16.mxu0 %v5308_v33  ;;  %3698 = vmatprep.subr.bf16.mxu1 %v5311_v34  ;;  %v5390_v33 = vld [vmem:[#allocation3 + $0x7e0] ss:$16 sps:$4 sm:$0xff]   ;;  %v5393_v34 = vld [vmem:[#allocation3 + $0x7e8] ss:$16 sps:$4 sm:$0xff]  }
  0xfb   :  { %3400 = vmatprep.mubr.bf16.mxu0 %v164_v35  ;;  %3728 = vmatprep.mubr.bf16.mxu1 %v164_v35  ;;  %v5399_v35 = vld [vmem:[#allocation3 + $0x804] ss:$16 sps:$4 sm:$0xff]  }
  0xfd   :  { %3371 = vmatpush1.bf16.msra.mxu0 %v5306_v36  ;;  %3699 = vmatpush1.bf16.msra.mxu1 %v5309_v37  ;;  %v5402_v36 = vld [vmem:[#allocation3 + $0x80c] ss:$16 sps:$4 sm:$0xff]   ;;  %v122_v37 = vcombine.high %v6032_v32, %v6032_v32 }
  0xfe   :  { %3372 = vmatprep.subr.bf16.mxu0 %v5314_v38  ;;  %3700 = vmatprep.subr.bf16.mxu1 %v5317_v39  ;;  %v5397_v38 = vld [vmem:[#allocation3 + $0x800] ss:$16 sps:$4 sm:$0xff]   ;;  %v163_v39 = vpack.c.bf16 %v6019_v25, %v6019_v25 }
  0xff   :  { %v5409_v25 = vld [vmem:[#allocation3 + $0x840] ss:$16 sps:$4 sm:$0xff]  }
 0x101   :  { %3373 = vmatpush1.bf16.msra.mxu0 %v5312_v26  ;;  %3701 = vmatpush1.bf16.msra.mxu1 %v5315_v40  ;;  %v5400_v26 = vld [vmem:[#allocation3 + $0x808] ss:$16 sps:$4 sm:$0xff]   ;;  %v5405_v40 = vld [vmem:[#allocation3 + $0x824] ss:$16 sps:$4 sm:$0xff]  }
 0x102   :  { %3374 = vmatprep.subr.bf16.mxu0 %v5320_v41  ;;  %3702 = vmatprep.subr.bf16.mxu1 %v5323_v42  ;;  %v5408_v41 = vld [vmem:[#allocation3 + $0x82c] ss:$16 sps:$4 sm:$0xff]   ;;  %v166_v42 = vpack.c.bf16 %v122_v37, %v122_v37  ;;  %v5481_v37 = vld [vmem:[#allocation3 + $0x9c0] ss:$16 sps:$4 sm:$0xff]  }
 0x105   :  { %3375 = vmatpush1.bf16.msra.mxu0 %v5318_v44  ;;  %3703 = vmatpush1.bf16.msra.mxu1 %v5321_v45  ;;  %v5403_v44 = vld [vmem:[#allocation3 + $0x820] ss:$16 sps:$4 sm:$0xff]   ;;  %v5406_v45 = vld [vmem:[#allocation3 + $0x828] ss:$16 sps:$4 sm:$0xff]  }
 0x106   :  { %3376 = vmatprep.subr.bf16.mxu0 %v5326_v46  ;;  %3704 = vmatprep.subr.bf16.mxu1 %v5329_v47  ;;  %v5411_v46 = vld [vmem:[#allocation3 + $0x844] ss:$16 sps:$4 sm:$0xff]   ;;  %v5414_v47 = vld [vmem:[#allocation3 + $0x84c] ss:$16 sps:$4 sm:$0xff]  }
 0x109   :  { %3377 = vmatpush1.bf16.msra.mxu0 %v5324_v48  ;;  %3705 = vmatpush1.bf16.msra.mxu1 %v5327_v50  ;;  %v5412_v48 = vld [vmem:[#allocation3 + $0x848] ss:$16 sps:$4 sm:$0xff]   ;;  %v5417_v50 = vld [vmem:[#allocation3 + $0x864] ss:$16 sps:$4 sm:$0xff]  }
 0x10a   :  { %3378 = vmatprep.subr.bf16.mxu0 %v5332_v51  ;;  %3706 = vmatprep.subr.bf16.mxu1 %v5335_v52  ;;  %v5420_v51 = vld [vmem:[#allocation3 + $0x86c] ss:$16 sps:$4 sm:$0xff]   ;;  %v5415_v52 = vld [vmem:[#allocation3 + $0x860] ss:$16 sps:$4 sm:$0xff]  }
 0x10d   :  { %3379 = vmatpush1.bf16.msra.mxu0 %v5330_v53  ;;  %3707 = vmatpush1.bf16.msra.mxu1 %v5333_v54  ;;  %v5418_v53 = vld [vmem:[#allocation3 + $0x868] ss:$16 sps:$4 sm:$0xff]   ;;  %v5423_v54 = vld [vmem:[#allocation3 + $0x884] ss:$16 sps:$4 sm:$0xff]  }
 0x10e   :  { %3380 = vmatprep.subr.bf16.mxu0 %v5338_v55  ;;  %3708 = vmatprep.subr.bf16.mxu1 %v5341_v56  ;;  %v5426_v55 = vld [vmem:[#allocation3 + $0x88c] ss:$16 sps:$4 sm:$0xff]   ;;  %v5421_v56 = vld [vmem:[#allocation3 + $0x880] ss:$16 sps:$4 sm:$0xff]  }
 0x111   :  { %3381 = vmatpush1.bf16.msra.mxu0 %v5336_v57  ;;  %3709 = vmatpush1.bf16.msra.mxu1 %v5339_v58  ;;  %v5424_v57 = vld [vmem:[#allocation3 + $0x888] ss:$16 sps:$4 sm:$0xff]   ;;  %v5429_v58 = vld [vmem:[#allocation3 + $0x8a4] ss:$16 sps:$4 sm:$0xff]  }
 0x112   :  { %3382 = vmatprep.subr.bf16.mxu0 %v5344_v59  ;;  %3710 = vmatprep.subr.bf16.mxu1 %v5347_v60  ;;  %v5432_v59 = vld [vmem:[#allocation3 + $0x8ac] ss:$16 sps:$4 sm:$0xff]   ;;  %v5427_v60 = vld [vmem:[#allocation3 + $0x8a0] ss:$16 sps:$4 sm:$0xff]  }
 0x115   :  { %3383 = vmatpush1.bf16.msra.mxu0 %v5342_v61  ;;  %3711 = vmatpush1.bf16.msra.mxu1 %v5345_v62  ;;  %v5430_v61 = vld [vmem:[#allocation3 + $0x8a8] ss:$16 sps:$4 sm:$0xff]   ;;  %v5435_v62 = vld [vmem:[#allocation3 + $0x8c4] ss:$16 sps:$4 sm:$0xff]  }
 0x116   :  { %3384 = vmatprep.subr.bf16.mxu0 %v5350_v63  ;;  %3712 = vmatprep.subr.bf16.mxu1 %v5353_v0  ;;  %v5438_v63 = vld [vmem:[#allocation3 + $0x8cc] ss:$16 sps:$4 sm:$0xff]   ;;  %v5433_v0 = vld [vmem:[#allocation3 + $0x8c0] ss:$16 sps:$4 sm:$0xff]  }
 0x119   :  { %3385 = vmatpush1.bf16.msra.mxu0 %v5348_v1  ;;  %3713 = vmatpush1.bf16.msra.mxu1 %v5351_v2  ;;  %v5436_v1 = vld [vmem:[#allocation3 + $0x8c8] ss:$16 sps:$4 sm:$0xff]   ;;  %v5441_v2 = vld [vmem:[#allocation3 + $0x8e4] ss:$16 sps:$4 sm:$0xff]  }
 0x11a   :  { %3386 = vmatprep.subr.bf16.mxu0 %v5356_v3  ;;  %3714 = vmatprep.subr.bf16.mxu1 %v5359_v4  ;;  %v5444_v3 = vld [vmem:[#allocation3 + $0x8ec] ss:$16 sps:$4 sm:$0xff]   ;;  %v5439_v4 = vld [vmem:[#allocation3 + $0x8e0] ss:$16 sps:$4 sm:$0xff]  }
 0x11d   :  { %3387 = vmatpush1.bf16.msra.mxu0 %v5354_v5  ;;  %3715 = vmatpush1.bf16.msra.mxu1 %v5357_v6  ;;  %v5442_v5 = vld [vmem:[#allocation3 + $0x8e8] ss:$16 sps:$4 sm:$0xff]   ;;  %v5447_v6 = vld [vmem:[#allocation3 + $0x904] ss:$16 sps:$4 sm:$0xff]  }
 0x11e   :  { %3388 = vmatprep.subr.bf16.mxu0 %v5362_v7  ;;  %3716 = vmatprep.subr.bf16.mxu1 %v5365_v8  ;;  %v5450_v7 = vld [vmem:[#allocation3 + $0x90c] ss:$16 sps:$4 sm:$0xff]   ;;  %v5445_v8 = vld [vmem:[#allocation3 + $0x900] ss:$16 sps:$4 sm:$0xff]  }
 0x121   :  { %3389 = vmatpush1.bf16.msra.mxu0 %v5360_v10  ;;  %3717 = vmatpush1.bf16.msra.mxu1 %v5363_v11  ;;  %v5448_v10 = vld [vmem:[#allocation3 + $0x908] ss:$16 sps:$4 sm:$0xff]   ;;  %v5453_v11 = vld [vmem:[#allocation3 + $0x924] ss:$16 sps:$4 sm:$0xff]  }
 0x122   :  { %3390 = vmatprep.subr.bf16.mxu0 %v5368_v12  ;;  %3718 = vmatprep.subr.bf16.mxu1 %v5371_v13  ;;  %v5456_v12 = vld [vmem:[#allocation3 + $0x92c] ss:$16 sps:$4 sm:$0xff]   ;;  %v5451_v13 = vld [vmem:[#allocation3 + $0x920] ss:$16 sps:$4 sm:$0xff]  }
 0x125   :  { %3391 = vmatpush1.bf16.msra.mxu0 %v5366_v14  ;;  %3719 = vmatpush1.bf16.msra.mxu1 %v5369_v15  ;;  %v5454_v14 = vld [vmem:[#allocation3 + $0x928] ss:$16 sps:$4 sm:$0xff]   ;;  %v5459_v15 = vld [vmem:[#allocation3 + $0x944] ss:$16 sps:$4 sm:$0xff]  }
 0x126   :  { %3392 = vmatprep.subr.bf16.mxu0 %v5374_v16  ;;  %3720 = vmatprep.subr.bf16.mxu1 %v5377_v17  ;;  %v5462_v16 = vld [vmem:[#allocation3 + $0x94c] ss:$16 sps:$4 sm:$0xff]   ;;  %v5457_v17 = vld [vmem:[#allocation3 + $0x940] ss:$16 sps:$4 sm:$0xff]  }
 0x129   :  { %3393 = vmatpush1.bf16.msra.mxu0 %v5372_v18  ;;  %3721 = vmatpush1.bf16.msra.mxu1 %v5375_v19  ;;  %v5460_v18 = vld [vmem:[#allocation3 + $0x948] ss:$16 sps:$4 sm:$0xff]   ;;  %v5465_v19 = vld [vmem:[#allocation3 + $0x964] ss:$16 sps:$4 sm:$0xff]  }
 0x12a   :  { %3394 = vmatprep.subr.bf16.mxu0 %v5380_v20  ;;  %3722 = vmatprep.subr.bf16.mxu1 %v5383_v21  ;;  %v5468_v20 = vld [vmem:[#allocation3 + $0x96c] ss:$16 sps:$4 sm:$0xff]   ;;  %v5463_v21 = vld [vmem:[#allocation3 + $0x960] ss:$16 sps:$4 sm:$0xff]  }
 0x12d   :  { %3395 = vmatpush1.bf16.msra.mxu0 %v5378_v22  ;;  %3723 = vmatpush1.bf16.msra.mxu1 %v5381_v24  ;;  %v5466_v22 = vld [vmem:[#allocation3 + $0x968] ss:$16 sps:$4 sm:$0xff]   ;;  %v5471_v24 = vld [vmem:[#allocation3 + $0x984] ss:$16 sps:$4 sm:$0xff]  }
 0x12e   :  { %3396 = vmatprep.subr.bf16.mxu0 %v5386_v9  ;;  %3724 = vmatprep.subr.bf16.mxu1 %v5389_v27  ;;  %v5474_v9 = vld [vmem:[#allocation3 + $0x98c] ss:$16 sps:$4 sm:$0xff]   ;;  %v5469_v27 = vld [vmem:[#allocation3 + $0x980] ss:$16 sps:$4 sm:$0xff]  }
 0x131   :  { %3397 = vmatpush1.bf16.msra.mxu0 %v5384_v28  ;;  %3725 = vmatpush1.bf16.msra.mxu1 %v5387_v23  ;;  %v5472_v28 = vld [vmem:[#allocation3 + $0x988] ss:$16 sps:$4 sm:$0xff]   ;;  %v5477_v23 = vld [vmem:[#allocation3 + $0x9a4] ss:$16 sps:$4 sm:$0xff]  }
 0x132   :  { %3398 = vmatprep.subr.bf16.mxu0 %v5392_v30  ;;  %3726 = vmatprep.subr.bf16.mxu1 %v5395_v31  ;;  %v5480_v30 = vld [vmem:[#allocation3 + $0x9ac] ss:$16 sps:$4 sm:$0xff]   ;;  %v5475_v31 = vld [vmem:[#allocation3 + $0x9a0] ss:$16 sps:$4 sm:$0xff]  }
 0x135   :  { %3399 = vmatpush1.bf16.msra.mxu0 %v5390_v33  ;;  %3727 = vmatpush1.bf16.msra.mxu1 %v5393_v34  ;;  %v5478_v33 = vld [vmem:[#allocation3 + $0x9a8] ss:$16 sps:$4 sm:$0xff]   ;;  %v5483_v34 = vld [vmem:[#allocation3 + $0x9c4] ss:$16 sps:$4 sm:$0xff]  }
 0x136   :  { %3409 = vmatprep.subr.bf16.mxu0 %v5399_v35  ;;  %3737 = vmatprep.subr.bf16.mxu1 %v5402_v36  ;;  %v5486_v35 = vld [vmem:[#allocation3 + $0x9cc] ss:$16 sps:$4 sm:$0xff]   ;;  %v107_v36 = vcombine.high %v6028_v29, %v6028_v29 }
 0x138   :  { %3401 = vmatmul.mubr.bf16.vlgmr.msra.gmra.mrb[0].mxu0 %v163_v39  ;;  %3729 = vmatmul.mubr.bf16.vlgmr.msra.gmra.mrb[0].mxu1 %v163_v39  ;;  %v5489_v39 = vld [vmem:[#allocation3 + $0x9e4] ss:$16 sps:$4 sm:$0xff]  }
 0x139   :  { %3410 = vmatpush1.bf16.msra.mxu0 %v5397_v38  ;;  %3738 = vmatpush1.bf16.msra.mxu1 %v5400_v26  ;;  %v5484_v38 = vld [vmem:[#allocation3 + $0x9c8] ss:$16 sps:$4 sm:$0xff]   ;;  %v5492_v26 = vld [vmem:[#allocation3 + $0x9ec] ss:$16 sps:$4 sm:$0xff]  }
 0x13a   :  { %3411 = vmatprep.subr.bf16.mxu0 %v5405_v40  ;;  %3739 = vmatprep.subr.bf16.mxu1 %v5408_v41  ;;  %v6041_v40 = vrot.slane %v107_v36, %v5992_v49  ;;  %v5487_v41 = vld [vmem:[#allocation3 + $0x9e0] ss:$16 sps:$4 sm:$0xff]   ;;  %v5568_v36 = vld [vmem:[#allocation3 + $0xb88] ss:$16 sps:$4 sm:$0xff]  }
 0x13b   :  { %3441 = vmatprep.mubr.bf16.mxu0 %v166_v42  ;;  %3769 = vmatprep.mubr.bf16.mxu1 %v166_v42  ;;  %v5490_v42 = vld [vmem:[#allocation3 + $0x9e8] ss:$16 sps:$4 sm:$0xff]  }
 0x13c   :  { %v123_v29 = vcombine.high %v6041_v40, %v6041_v40 }
 0x13d   :  { %3412 = vmatpush1.bf16.msra.mxu0 %v5403_v44  ;;  %3740 = vmatpush1.bf16.msra.mxu1 %v5406_v45  ;;  %v5495_v44 = vld [vmem:[#allocation3 + $0xa04] ss:$16 sps:$4 sm:$0xff]   ;;  %v5498_v45 = vld [vmem:[#allocation3 + $0xa0c] ss:$16 sps:$4 sm:$0xff]  }
 0x13e   :  { %3413 = vmatprep.subr.bf16.mxu0 %v5411_v46  ;;  %3741 = vmatprep.subr.bf16.mxu1 %v5414_v47  ;;  %v165_v46 = vpack.c.bf16 %v6032_v32, %v6032_v32  ;;  %v5493_v47 = vld [vmem:[#allocation3 + $0xa00] ss:$16 sps:$4 sm:$0xff]  }
 0x13f   :  { %v5505_v32 = vld [vmem:[#allocation3 + $0xa40] ss:$16 sps:$4 sm:$0xff]  }
 0x141   :  { %3414 = vmatpush1.bf16.msra.mxu0 %v5409_v25  ;;  %3742 = vmatpush1.bf16.msra.mxu1 %v5412_v48  ;;  %v5496_v25 = vld [vmem:[#allocation3 + $0xa08] ss:$16 sps:$4 sm:$0xff]   ;;  %v5501_v48 = vld [vmem:[#allocation3 + $0xa24] ss:$16 sps:$4 sm:$0xff]  }
 0x142   :  { %3415 = vmatprep.subr.bf16.mxu0 %v5417_v50  ;;  %3743 = vmatprep.subr.bf16.mxu1 %v5420_v51  ;;  %v5504_v50 = vld [vmem:[#allocation3 + $0xa2c] ss:$16 sps:$4 sm:$0xff]   ;;  %v168_v51 = vpack.c.bf16 %v123_v29, %v123_v29  ;;  %v5580_v29 = vld [vmem:[#allocation3 + $0xbc8] ss:$16 sps:$4 sm:$0xff]  }
 0x145   :  { %3416 = vmatpush1.bf16.msra.mxu0 %v5415_v52  ;;  %3744 = vmatpush1.bf16.msra.mxu1 %v5418_v53  ;;  %v5499_v52 = vld [vmem:[#allocation3 + $0xa20] ss:$16 sps:$4 sm:$0xff]   ;;  %v5502_v53 = vld [vmem:[#allocation3 + $0xa28] ss:$16 sps:$4 sm:$0xff]  }
 0x146   :  { %3417 = vmatprep.subr.bf16.mxu0 %v5423_v54  ;;  %3745 = vmatprep.subr.bf16.mxu1 %v5426_v55  ;;  %v5507_v54 = vld [vmem:[#allocation3 + $0xa44] ss:$16 sps:$4 sm:$0xff]   ;;  %v5510_v55 = vld [vmem:[#allocation3 + $0xa4c] ss:$16 sps:$4 sm:$0xff]  }
 0x149   :  { %3418 = vmatpush1.bf16.msra.mxu0 %v5421_v56  ;;  %3746 = vmatpush1.bf16.msra.mxu1 %v5424_v57  ;;  %v5508_v56 = vld [vmem:[#allocation3 + $0xa48] ss:$16 sps:$4 sm:$0xff]   ;;  %v5513_v57 = vld [vmem:[#allocation3 + $0xa64] ss:$16 sps:$4 sm:$0xff]  }
 0x14a   :  { %3419 = vmatprep.subr.bf16.mxu0 %v5429_v58  ;;  %3747 = vmatprep.subr.bf16.mxu1 %v5432_v59  ;;  %v5516_v58 = vld [vmem:[#allocation3 + $0xa6c] ss:$16 sps:$4 sm:$0xff]   ;;  %v5511_v59 = vld [vmem:[#allocation3 + $0xa60] ss:$16 sps:$4 sm:$0xff]  }
 0x14d   :  { %3420 = vmatpush1.bf16.msra.mxu0 %v5427_v60  ;;  %3748 = vmatpush1.bf16.msra.mxu1 %v5430_v61  ;;  %v5514_v60 = vld [vmem:[#allocation3 + $0xa68] ss:$16 sps:$4 sm:$0xff]   ;;  %v5519_v61 = vld [vmem:[#allocation3 + $0xa84] ss:$16 sps:$4 sm:$0xff]  }
 0x14e   :  { %3421 = vmatprep.subr.bf16.mxu0 %v5435_v62  ;;  %3749 = vmatprep.subr.bf16.mxu1 %v5438_v63  ;;  %v5522_v62 = vld [vmem:[#allocation3 + $0xa8c] ss:$16 sps:$4 sm:$0xff]   ;;  %v5517_v63 = vld [vmem:[#allocation3 + $0xa80] ss:$16 sps:$4 sm:$0xff]  }
 0x151   :  { %3422 = vmatpush1.bf16.msra.mxu0 %v5433_v0  ;;  %3750 = vmatpush1.bf16.msra.mxu1 %v5436_v1  ;;  %v5520_v0 = vld [vmem:[#allocation3 + $0xa88] ss:$16 sps:$4 sm:$0xff]   ;;  %v5525_v1 = vld [vmem:[#allocation3 + $0xaa4] ss:$16 sps:$4 sm:$0xff]  }
 0x152   :  { %3423 = vmatprep.subr.bf16.mxu0 %v5441_v2  ;;  %3751 = vmatprep.subr.bf16.mxu1 %v5444_v3  ;;  %v5528_v2 = vld [vmem:[#allocation3 + $0xaac] ss:$16 sps:$4 sm:$0xff]   ;;  %v5523_v3 = vld [vmem:[#allocation3 + $0xaa0] ss:$16 sps:$4 sm:$0xff]  }
 0x155   :  { %3424 = vmatpush1.bf16.msra.mxu0 %v5439_v4  ;;  %3752 = vmatpush1.bf16.msra.mxu1 %v5442_v5  ;;  %v5526_v4 = vld [vmem:[#allocation3 + $0xaa8] ss:$16 sps:$4 sm:$0xff]   ;;  %v5531_v5 = vld [vmem:[#allocation3 + $0xac4] ss:$16 sps:$4 sm:$0xff]  }
 0x156   :  { %3425 = vmatprep.subr.bf16.mxu0 %v5447_v6  ;;  %3753 = vmatprep.subr.bf16.mxu1 %v5450_v7  ;;  %v5534_v6 = vld [vmem:[#allocation3 + $0xacc] ss:$16 sps:$4 sm:$0xff]   ;;  %v5529_v7 = vld [vmem:[#allocation3 + $0xac0] ss:$16 sps:$4 sm:$0xff]  }
 0x159   :  { %3426 = vmatpush1.bf16.msra.mxu0 %v5445_v8  ;;  %3754 = vmatpush1.bf16.msra.mxu1 %v5448_v10  ;;  %v5532_v8 = vld [vmem:[#allocation3 + $0xac8] ss:$16 sps:$4 sm:$0xff]   ;;  %v5537_v10 = vld [vmem:[#allocation3 + $0xae4] ss:$16 sps:$4 sm:$0xff]  }
 0x15a   :  { %3427 = vmatprep.subr.bf16.mxu0 %v5453_v11  ;;  %3755 = vmatprep.subr.bf16.mxu1 %v5456_v12  ;;  %v5540_v11 = vld [vmem:[#allocation3 + $0xaec] ss:$16 sps:$4 sm:$0xff]   ;;  %v5535_v12 = vld [vmem:[#allocation3 + $0xae0] ss:$16 sps:$4 sm:$0xff]  }
 0x15d   :  { %3428 = vmatpush1.bf16.msra.mxu0 %v5451_v13  ;;  %3756 = vmatpush1.bf16.msra.mxu1 %v5454_v14  ;;  %v5538_v13 = vld [vmem:[#allocation3 + $0xae8] ss:$16 sps:$4 sm:$0xff]   ;;  %v5543_v14 = vld [vmem:[#allocation3 + $0xb04] ss:$16 sps:$4 sm:$0xff]  }
 0x15e   :  { %3429 = vmatprep.subr.bf16.mxu0 %v5459_v15  ;;  %3757 = vmatprep.subr.bf16.mxu1 %v5462_v16  ;;  %v5546_v15 = vld [vmem:[#allocation3 + $0xb0c] ss:$16 sps:$4 sm:$0xff]   ;;  %v5541_v16 = vld [vmem:[#allocation3 + $0xb00] ss:$16 sps:$4 sm:$0xff]  }
 0x161   :  { %3430 = vmatpush1.bf16.msra.mxu0 %v5457_v17  ;;  %3758 = vmatpush1.bf16.msra.mxu1 %v5460_v18  ;;  %v5544_v17 = vld [vmem:[#allocation3 + $0xb08] ss:$16 sps:$4 sm:$0xff]   ;;  %v5549_v18 = vld [vmem:[#allocation3 + $0xb24] ss:$16 sps:$4 sm:$0xff]  }
 0x162   :  { %3431 = vmatprep.subr.bf16.mxu0 %v5465_v19  ;;  %3759 = vmatprep.subr.bf16.mxu1 %v5468_v20  ;;  %v5552_v19 = vld [vmem:[#allocation3 + $0xb2c] ss:$16 sps:$4 sm:$0xff]   ;;  %v5547_v20 = vld [vmem:[#allocation3 + $0xb20] ss:$16 sps:$4 sm:$0xff]  }
 0x165   :  { %3432 = vmatpush1.bf16.msra.mxu0 %v5463_v21  ;;  %3760 = vmatpush1.bf16.msra.mxu1 %v5466_v22  ;;  %v5550_v21 = vld [vmem:[#allocation3 + $0xb28] ss:$16 sps:$4 sm:$0xff]   ;;  %v5555_v22 = vld [vmem:[#allocation3 + $0xb44] ss:$16 sps:$4 sm:$0xff]  }
 0x166   :  { %3433 = vmatprep.subr.bf16.mxu0 %v5471_v24  ;;  %3761 = vmatprep.subr.bf16.mxu1 %v5474_v9  ;;  %v5558_v24 = vld [vmem:[#allocation3 + $0xb4c] ss:$16 sps:$4 sm:$0xff]   ;;  %v5553_v9 = vld [vmem:[#allocation3 + $0xb40] ss:$16 sps:$4 sm:$0xff]  }
 0x169   :  { %3434 = vmatpush1.bf16.msra.mxu0 %v5469_v27  ;;  %3762 = vmatpush1.bf16.msra.mxu1 %v5472_v28  ;;  %v5556_v27 = vld [vmem:[#allocation3 + $0xb48] ss:$16 sps:$4 sm:$0xff]   ;;  %v5561_v28 = vld [vmem:[#allocation3 + $0xb64] ss:$16 sps:$4 sm:$0xff]  }
 0x16a   :  { %3435 = vmatprep.subr.bf16.mxu0 %v5477_v23  ;;  %3763 = vmatprep.subr.bf16.mxu1 %v5480_v30  ;;  %v5564_v23 = vld [vmem:[#allocation3 + $0xb6c] ss:$16 sps:$4 sm:$0xff]   ;;  %v5559_v30 = vld [vmem:[#allocation3 + $0xb60] ss:$16 sps:$4 sm:$0xff]  }
 0x16d   :  { %3436 = vmatpush1.bf16.msra.mxu0 %v5475_v31  ;;  %3764 = vmatpush1.bf16.msra.mxu1 %v5478_v33  ;;  %v5562_v31 = vld [vmem:[#allocation3 + $0xb68] ss:$16 sps:$4 sm:$0xff]   ;;  %v5567_v33 = vld [vmem:[#allocation3 + $0xb84] ss:$16 sps:$4 sm:$0xff]  }
 0x16e   :  { %3437 = vmatprep.subr.bf16.mxu0 %v5483_v34  ;;  %3765 = vmatprep.subr.bf16.mxu1 %v5486_v35  ;;  %v5570_v34 = vld [vmem:[#allocation3 + $0xb8c] ss:$16 sps:$4 sm:$0xff]   ;;  %v5565_v35 = vld [vmem:[#allocation3 + $0xb80] ss:$16 sps:$4 sm:$0xff]  }
 0x171   :  { %3438 = vmatpush1.bf16.msra.mxu0 %v5481_v37  ;;  %3766 = vmatpush1.bf16.msra.mxu1 %v5484_v38  ;;  %v5573_v37 = vld [vmem:[#allocation3 + $0xba4] ss:$16 sps:$4 sm:$0xff]   ;;  %v5576_v38 = vld [vmem:[#allocation3 + $0xbac] ss:$16 sps:$4 sm:$0xff]  }
 0x172   :  { %3439 = vmatprep.subr.bf16.mxu0 %v5489_v39  ;;  %3767 = vmatprep.subr.bf16.mxu1 %v5492_v26  ;;  %v5571_v39 = vld [vmem:[#allocation3 + $0xba0] ss:$16 sps:$4 sm:$0xff]   ;;  %v5574_v26 = vld [vmem:[#allocation3 + $0xba8] ss:$16 sps:$4 sm:$0xff]  }
 0x175   :  { %3440 = vmatpush1.bf16.msra.mxu0 %v5487_v41  ;;  %3768 = vmatpush1.bf16.msra.mxu1 %v5490_v42  ;;  %v5579_v41 = vld [vmem:[#allocation3 + $0xbc4] ss:$16 sps:$4 sm:$0xff]   ;;  %v5582_v42 = vld [vmem:[#allocation3 + $0xbcc] ss:$16 sps:$4 sm:$0xff]  }
 0x176   :  { %3450 = vmatprep.subr.bf16.mxu0 %v5495_v44  ;;  %3778 = vmatprep.subr.bf16.mxu1 %v5498_v45  ;;  %v6050_v44 = vld [vmem:[%s6189_s0 + $0x18] sm:$0xff]  ;;  %v5577_v45 = vld [vmem:[#allocation3 + $0xbc0] ss:$16 sps:$4 sm:$0xff]  }
 0x178   :  { %3442 = vmatmul.mubr.bf16.vlgmr.msra.gmra.mrb[0].mxu0 %v165_v46  ;;  %3770 = vmatmul.mubr.bf16.vlgmr.msra.gmra.mrb[0].mxu1 %v165_v46  ;;  %v5585_v46 = vld [vmem:[#allocation3 + $0xbe4] ss:$16 sps:$4 sm:$0xff]  }
 0x179   :  { %3451 = vmatpush1.bf16.msra.mxu0 %v5493_v47  ;;  %3779 = vmatpush1.bf16.msra.mxu1 %v5496_v25  ;;  %v5588_v47 = vld [vmem:[#allocation3 + $0xbec] ss:$16 sps:$4 sm:$0xff]   ;;  %v6054_v25 = vrot.slane %v6050_v44, %v5992_v49 }
 0x17a   :  { %3452 = vmatprep.subr.bf16.mxu0 %v5501_v48  ;;  %3780 = vmatprep.subr.bf16.mxu1 %v5504_v50  ;;  %v5583_v48 = vld [vmem:[#allocation3 + $0xbe0] ss:$16 sps:$4 sm:$0xff]   ;;  %v5586_v50 = vld [vmem:[#allocation3 + $0xbe8] ss:$16 sps:$4 sm:$0xff]  }
 0x17b   :  { %3482 = vmatprep.mubr.bf16.mxu0 %v168_v51  ;;  %3810 = vmatprep.mubr.bf16.mxu1 %v168_v51  ;;  %v5592_v51 = vld [vmem:[#allocation3 + $0xc04] ss:$16 sps:$4 sm:$0xff]  }
 0x17d   :  { %3453 = vmatpush1.bf16.msra.mxu0 %v5499_v52  ;;  %3781 = vmatpush1.bf16.msra.mxu1 %v5502_v53  ;;  %v5595_v52 = vld [vmem:[#allocation3 + $0xc0c] ss:$16 sps:$4 sm:$0xff]   ;;  %v139_v53 = vcombine.high %v6054_v25, %v6054_v25 }
 0x17e   :  { %3454 = vmatprep.subr.bf16.mxu0 %v5507_v54  ;;  %3782 = vmatprep.subr.bf16.mxu1 %v5510_v55  ;;  %v167_v54 = vpack.c.bf16 %v6041_v40, %v6041_v40  ;;  %v5590_v55 = vld [vmem:[#allocation3 + $0xc00] ss:$16 sps:$4 sm:$0xff]  }
 0x17f   :  { %v5602_v40 = vld [vmem:[#allocation3 + $0xc40] ss:$16 sps:$4 sm:$0xff]  }
 0x181   :  { %3455 = vmatpush1.bf16.msra.mxu0 %v5505_v32  ;;  %3783 = vmatpush1.bf16.msra.mxu1 %v5508_v56  ;;  %v5593_v32 = vld [vmem:[#allocation3 + $0xc08] ss:$16 sps:$4 sm:$0xff]   ;;  %v5598_v56 = vld [vmem:[#allocation3 + $0xc24] ss:$16 sps:$4 sm:$0xff]  }
 0x182   :  { %3456 = vmatprep.subr.bf16.mxu0 %v5513_v57  ;;  %3784 = vmatprep.subr.bf16.mxu1 %v5516_v58  ;;  %v5601_v57 = vld [vmem:[#allocation3 + $0xc2c] ss:$16 sps:$4 sm:$0xff]   ;;  %v170_v58 = vpack.c.bf16 %v139_v53, %v139_v53  ;;  %v5674_v53 = vld [vmem:[#allocation3 + $0xdc0] ss:$16 sps:$4 sm:$0xff]  }
 0x185   :  { %3457 = vmatpush1.bf16.msra.mxu0 %v5511_v59  ;;  %3785 = vmatpush1.bf16.msra.mxu1 %v5514_v60  ;;  %v5596_v59 = vld [vmem:[#allocation3 + $0xc20] ss:$16 sps:$4 sm:$0xff]   ;;  %v5599_v60 = vld [vmem:[#allocation3 + $0xc28] ss:$16 sps:$4 sm:$0xff]  }
 0x186   :  { %3458 = vmatprep.subr.bf16.mxu0 %v5519_v61  ;;  %3786 = vmatprep.subr.bf16.mxu1 %v5522_v62  ;;  %v5604_v61 = vld [vmem:[#allocation3 + $0xc44] ss:$16 sps:$4 sm:$0xff]   ;;  %v5607_v62 = vld [vmem:[#allocation3 + $0xc4c] ss:$16 sps:$4 sm:$0xff]  }
 0x189   :  { %3459 = vmatpush1.bf16.msra.mxu0 %v5517_v63  ;;  %3787 = vmatpush1.bf16.msra.mxu1 %v5520_v0  ;;  %v5605_v63 = vld [vmem:[#allocation3 + $0xc48] ss:$16 sps:$4 sm:$0xff]   ;;  %v5610_v0 = vld [vmem:[#allocation3 + $0xc64] ss:$16 sps:$4 sm:$0xff]  }
 0x18a   :  { %3460 = vmatprep.subr.bf16.mxu0 %v5525_v1  ;;  %3788 = vmatprep.subr.bf16.mxu1 %v5528_v2  ;;  %v5613_v1 = vld [vmem:[#allocation3 + $0xc6c] ss:$16 sps:$4 sm:$0xff]   ;;  %v5608_v2 = vld [vmem:[#allocation3 + $0xc60] ss:$16 sps:$4 sm:$0xff]  }
 0x18d   :  { %3461 = vmatpush1.bf16.msra.mxu0 %v5523_v3  ;;  %3789 = vmatpush1.bf16.msra.mxu1 %v5526_v4  ;;  %v5611_v3 = vld [vmem:[#allocation3 + $0xc68] ss:$16 sps:$4 sm:$0xff]   ;;  %v5616_v4 = vld [vmem:[#allocation3 + $0xc84] ss:$16 sps:$4 sm:$0xff]  }
 0x18e   :  { %3462 = vmatprep.subr.bf16.mxu0 %v5531_v5  ;;  %3790 = vmatprep.subr.bf16.mxu1 %v5534_v6  ;;  %v5619_v5 = vld [vmem:[#allocation3 + $0xc8c] ss:$16 sps:$4 sm:$0xff]   ;;  %v5614_v6 = vld [vmem:[#allocation3 + $0xc80] ss:$16 sps:$4 sm:$0xff]  }
 0x191   :  { %3463 = vmatpush1.bf16.msra.mxu0 %v5529_v7  ;;  %3791 = vmatpush1.bf16.msra.mxu1 %v5532_v8  ;;  %v5617_v7 = vld [vmem:[#allocation3 + $0xc88] ss:$16 sps:$4 sm:$0xff]   ;;  %v5622_v8 = vld [vmem:[#allocation3 + $0xca4] ss:$16 sps:$4 sm:$0xff]  }
 0x192   :  { %3464 = vmatprep.subr.bf16.mxu0 %v5537_v10  ;;  %3792 = vmatprep.subr.bf16.mxu1 %v5540_v11  ;;  %v5625_v10 = vld [vmem:[#allocation3 + $0xcac] ss:$16 sps:$4 sm:$0xff]   ;;  %v5620_v11 = vld [vmem:[#allocation3 + $0xca0] ss:$16 sps:$4 sm:$0xff]  }
 0x195   :  { %3465 = vmatpush1.bf16.msra.mxu0 %v5535_v12  ;;  %3793 = vmatpush1.bf16.msra.mxu1 %v5538_v13  ;;  %v5623_v12 = vld [vmem:[#allocation3 + $0xca8] ss:$16 sps:$4 sm:$0xff]   ;;  %v5628_v13 = vld [vmem:[#allocation3 + $0xcc4] ss:$16 sps:$4 sm:$0xff]  }
 0x196   :  { %3466 = vmatprep.subr.bf16.mxu0 %v5543_v14  ;;  %3794 = vmatprep.subr.bf16.mxu1 %v5546_v15  ;;  %v5631_v14 = vld [vmem:[#allocation3 + $0xccc] ss:$16 sps:$4 sm:$0xff]   ;;  %v5626_v15 = vld [vmem:[#allocation3 + $0xcc0] ss:$16 sps:$4 sm:$0xff]  }
 0x199   :  { %3467 = vmatpush1.bf16.msra.mxu0 %v5541_v16  ;;  %3795 = vmatpush1.bf16.msra.mxu1 %v5544_v17  ;;  %v5629_v16 = vld [vmem:[#allocation3 + $0xcc8] ss:$16 sps:$4 sm:$0xff]   ;;  %v5634_v17 = vld [vmem:[#allocation3 + $0xce4] ss:$16 sps:$4 sm:$0xff]  }
 0x19a   :  { %3468 = vmatprep.subr.bf16.mxu0 %v5549_v18  ;;  %3796 = vmatprep.subr.bf16.mxu1 %v5552_v19  ;;  %v5637_v18 = vld [vmem:[#allocation3 + $0xcec] ss:$16 sps:$4 sm:$0xff]   ;;  %v5632_v19 = vld [vmem:[#allocation3 + $0xce0] ss:$16 sps:$4 sm:$0xff]  }
 0x19d   :  { %3469 = vmatpush1.bf16.msra.mxu0 %v5547_v20  ;;  %3797 = vmatpush1.bf16.msra.mxu1 %v5550_v21  ;;  %v5635_v20 = vld [vmem:[#allocation3 + $0xce8] ss:$16 sps:$4 sm:$0xff]   ;;  %v5640_v21 = vld [vmem:[#allocation3 + $0xd04] ss:$16 sps:$4 sm:$0xff]  }
 0x19e   :  { %3470 = vmatprep.subr.bf16.mxu0 %v5555_v22  ;;  %3798 = vmatprep.subr.bf16.mxu1 %v5558_v24  ;;  %v5643_v22 = vld [vmem:[#allocation3 + $0xd0c] ss:$16 sps:$4 sm:$0xff]   ;;  %v5638_v24 = vld [vmem:[#allocation3 + $0xd00] ss:$16 sps:$4 sm:$0xff]  }
 0x1a1   :  { %3471 = vmatpush1.bf16.msra.mxu0 %v5553_v9  ;;  %3799 = vmatpush1.bf16.msra.mxu1 %v5556_v27  ;;  %v5641_v9 = vld [vmem:[#allocation3 + $0xd08] ss:$16 sps:$4 sm:$0xff]   ;;  %v5646_v27 = vld [vmem:[#allocation3 + $0xd24] ss:$16 sps:$4 sm:$0xff]  }
 0x1a2   :  { %3472 = vmatprep.subr.bf16.mxu0 %v5561_v28  ;;  %3800 = vmatprep.subr.bf16.mxu1 %v5564_v23  ;;  %v5649_v28 = vld [vmem:[#allocation3 + $0xd2c] ss:$16 sps:$4 sm:$0xff]   ;;  %v5644_v23 = vld [vmem:[#allocation3 + $0xd20] ss:$16 sps:$4 sm:$0xff]  }
 0x1a5   :  { %3473 = vmatpush1.bf16.msra.mxu0 %v5559_v30  ;;  %3801 = vmatpush1.bf16.msra.mxu1 %v5562_v31  ;;  %v5647_v30 = vld [vmem:[#allocation3 + $0xd28] ss:$16 sps:$4 sm:$0xff]   ;;  %v5652_v31 = vld [vmem:[#allocation3 + $0xd44] ss:$16 sps:$4 sm:$0xff]  }
 0x1a6   :  { %3474 = vmatprep.subr.bf16.mxu0 %v5567_v33  ;;  %3802 = vmatprep.subr.bf16.mxu1 %v5570_v34  ;;  %v5655_v33 = vld [vmem:[#allocation3 + $0xd4c] ss:$16 sps:$4 sm:$0xff]   ;;  %v5650_v34 = vld [vmem:[#allocation3 + $0xd40] ss:$16 sps:$4 sm:$0xff]  }
 0x1a9   :  { %3475 = vmatpush1.bf16.msra.mxu0 %v5565_v35  ;;  %3803 = vmatpush1.bf16.msra.mxu1 %v5568_v36  ;;  %v5653_v35 = vld [vmem:[#allocation3 + $0xd48] ss:$16 sps:$4 sm:$0xff]   ;;  %v5658_v36 = vld [vmem:[#allocation3 + $0xd64] ss:$16 sps:$4 sm:$0xff]  }
 0x1aa   :  { %3476 = vmatprep.subr.bf16.mxu0 %v5573_v37  ;;  %3804 = vmatprep.subr.bf16.mxu1 %v5576_v38  ;;  %v5661_v37 = vld [vmem:[#allocation3 + $0xd6c] ss:$16 sps:$4 sm:$0xff]   ;;  %v5656_v38 = vld [vmem:[#allocation3 + $0xd60] ss:$16 sps:$4 sm:$0xff]  }
 0x1ad   :  { %3477 = vmatpush1.bf16.msra.mxu0 %v5571_v39  ;;  %3805 = vmatpush1.bf16.msra.mxu1 %v5574_v26  ;;  %v5659_v39 = vld [vmem:[#allocation3 + $0xd68] ss:$16 sps:$4 sm:$0xff]   ;;  %v5664_v26 = vld [vmem:[#allocation3 + $0xd84] ss:$16 sps:$4 sm:$0xff]  }
 0x1ae   :  { %3478 = vmatprep.subr.bf16.mxu0 %v5579_v41  ;;  %3806 = vmatprep.subr.bf16.mxu1 %v5582_v42  ;;  %v5667_v41 = vld [vmem:[#allocation3 + $0xd8c] ss:$16 sps:$4 sm:$0xff]   ;;  %v5662_v42 = vld [vmem:[#allocation3 + $0xd80] ss:$16 sps:$4 sm:$0xff]  }
 0x1b1   :  { %3479 = vmatpush1.bf16.msra.mxu0 %v5577_v45  ;;  %3807 = vmatpush1.bf16.msra.mxu1 %v5580_v29  ;;  %v5665_v45 = vld [vmem:[#allocation3 + $0xd88] ss:$16 sps:$4 sm:$0xff]   ;;  %v5670_v29 = vld [vmem:[#allocation3 + $0xda4] ss:$16 sps:$4 sm:$0xff]  }
 0x1b2   :  { %3480 = vmatprep.subr.bf16.mxu0 %v5585_v46  ;;  %3808 = vmatprep.subr.bf16.mxu1 %v5588_v47  ;;  %v5673_v46 = vld [vmem:[#allocation3 + $0xdac] ss:$16 sps:$4 sm:$0xff]   ;;  %v5668_v47 = vld [vmem:[#allocation3 + $0xda0] ss:$16 sps:$4 sm:$0xff]  }
 0x1b5   :  { %3481 = vmatpush1.bf16.msra.mxu0 %v5583_v48  ;;  %3809 = vmatpush1.bf16.msra.mxu1 %v5586_v50  ;;  %v5671_v48 = vld [vmem:[#allocation3 + $0xda8] ss:$16 sps:$4 sm:$0xff]   ;;  %v5676_v50 = vld [vmem:[#allocation3 + $0xdc4] ss:$16 sps:$4 sm:$0xff]  }
 0x1b6   :  { %3491 = vmatprep.subr.bf16.mxu0 %v5592_v51  ;;  %3819 = vmatprep.subr.bf16.mxu1 %v5595_v52  ;;  %v5679_v51 = vld [vmem:[#allocation3 + $0xdcc] ss:$16 sps:$4 sm:$0xff]   ;;  %v124_v52 = vcombine.high %v6050_v44, %v6050_v44 }
 0x1b8   :  { %3483 = vmatmul.mubr.bf16.vlgmr.msra.gmra.mrb[0].mxu0 %v167_v54  ;;  %3811 = vmatmul.mubr.bf16.vlgmr.msra.gmra.mrb[0].mxu1 %v167_v54  ;;  %v5677_v54 = vld [vmem:[#allocation3 + $0xdc8] ss:$16 sps:$4 sm:$0xff]  }
 0x1b9   :  { %3492 = vmatpush1.bf16.msra.mxu0 %v5590_v55  ;;  %3820 = vmatpush1.bf16.msra.mxu1 %v5593_v32  ;;  %v5682_v55 = vld [vmem:[#allocation3 + $0xde4] ss:$16 sps:$4 sm:$0xff]   ;;  %v5685_v32 = vld [vmem:[#allocation3 + $0xdec] ss:$16 sps:$4 sm:$0xff]  }
 0x1ba   :  { %3493 = vmatprep.subr.bf16.mxu0 %v5598_v56  ;;  %3821 = vmatprep.subr.bf16.mxu1 %v5601_v57  ;;  %v6063_v56 = vrot.slane %v124_v52, %v5992_v49  ;;  %v5680_v57 = vld [vmem:[#allocation3 + $0xde0] ss:$16 sps:$4 sm:$0xff]   ;;  %v5761_v52 = vld [vmem:[#allocation3 + $0xf88] ss:$16 sps:$4 sm:$0xff]  }
 0x1bb   :  { %3523 = vmatprep.mubr.bf16.mxu0 %v170_v58  ;;  %3851 = vmatprep.mubr.bf16.mxu1 %v170_v58  ;;  %v5683_v58 = vld [vmem:[#allocation3 + $0xde8] ss:$16 sps:$4 sm:$0xff]  }
 0x1bc   :  { %v140_v44 = vcombine.high %v6063_v56, %v6063_v56 }
 0x1bd   :  { %3494 = vmatpush1.bf16.msra.mxu0 %v5596_v59  ;;  %3822 = vmatpush1.bf16.msra.mxu1 %v5599_v60  ;;  %v5688_v59 = vld [vmem:[#allocation3 + $0xe04] ss:$16 sps:$4 sm:$0xff]   ;;  %v5691_v60 = vld [vmem:[#allocation3 + $0xe0c] ss:$16 sps:$4 sm:$0xff]  }
 0x1be   :  { %3495 = vmatprep.subr.bf16.mxu0 %v5604_v61  ;;  %3823 = vmatprep.subr.bf16.mxu1 %v5607_v62  ;;  %v169_v61 = vpack.c.bf16 %v6054_v25, %v6054_v25  ;;  %v5686_v62 = vld [vmem:[#allocation3 + $0xe00] ss:$16 sps:$4 sm:$0xff]  }
 0x1bf   :  { %v5698_v25 = vld [vmem:[#allocation3 + $0xe40] ss:$16 sps:$4 sm:$0xff]  }
 0x1c1   :  { %3496 = vmatpush1.bf16.msra.mxu0 %v5602_v40  ;;  %3824 = vmatpush1.bf16.msra.mxu1 %v5605_v63  ;;  %v5689_v40 = vld [vmem:[#allocation3 + $0xe08] ss:$16 sps:$4 sm:$0xff]   ;;  %v5694_v63 = vld [vmem:[#allocation3 + $0xe24] ss:$16 sps:$4 sm:$0xff]  }
 0x1c2   :  { %3497 = vmatprep.subr.bf16.mxu0 %v5610_v0  ;;  %3825 = vmatprep.subr.bf16.mxu1 %v5613_v1  ;;  %v5697_v0 = vld [vmem:[#allocation3 + $0xe2c] ss:$16 sps:$4 sm:$0xff]   ;;  %v172_v1 = vpack.c.bf16 %v140_v44, %v140_v44  ;;  %v5778_v44 = vld [vmem:[#allocation3 + $0xfe4] ss:$16 sps:$4 sm:$0xff]  }
 0x1c5   :  { %3498 = vmatpush1.bf16.msra.mxu0 %v5608_v2  ;;  %3826 = vmatpush1.bf16.msra.mxu1 %v5611_v3  ;;  %v5692_v2 = vld [vmem:[#allocation3 + $0xe20] ss:$16 sps:$4 sm:$0xff]   ;;  %v5695_v3 = vld [vmem:[#allocation3 + $0xe28] ss:$16 sps:$4 sm:$0xff]  }
 0x1c6   :  { %3499 = vmatprep.subr.bf16.mxu0 %v5616_v4  ;;  %3827 = vmatprep.subr.bf16.mxu1 %v5619_v5  ;;  %v5700_v4 = vld [vmem:[#allocation3 + $0xe44] ss:$16 sps:$4 sm:$0xff]   ;;  %v5703_v5 = vld [vmem:[#allocation3 + $0xe4c] ss:$16 sps:$4 sm:$0xff]  }
 0x1c9   :  { %3500 = vmatpush1.bf16.msra.mxu0 %v5614_v6  ;;  %3828 = vmatpush1.bf16.msra.mxu1 %v5617_v7  ;;  %v5701_v6 = vld [vmem:[#allocation3 + $0xe48] ss:$16 sps:$4 sm:$0xff]   ;;  %v5706_v7 = vld [vmem:[#allocation3 + $0xe64] ss:$16 sps:$4 sm:$0xff]  }
 0x1ca   :  { %3501 = vmatprep.subr.bf16.mxu0 %v5622_v8  ;;  %3829 = vmatprep.subr.bf16.mxu1 %v5625_v10  ;;  %v5709_v8 = vld [vmem:[#allocation3 + $0xe6c] ss:$16 sps:$4 sm:$0xff]   ;;  %v5704_v10 = vld [vmem:[#allocation3 + $0xe60] ss:$16 sps:$4 sm:$0xff]  }
 0x1cd   :  { %3502 = vmatpush1.bf16.msra.mxu0 %v5620_v11  ;;  %3830 = vmatpush1.bf16.msra.mxu1 %v5623_v12  ;;  %v5707_v11 = vld [vmem:[#allocation3 + $0xe68] ss:$16 sps:$4 sm:$0xff]   ;;  %v5712_v12 = vld [vmem:[#allocation3 + $0xe84] ss:$16 sps:$4 sm:$0xff]  }
 0x1ce   :  { %3503 = vmatprep.subr.bf16.mxu0 %v5628_v13  ;;  %3831 = vmatprep.subr.bf16.mxu1 %v5631_v14  ;;  %v5715_v13 = vld [vmem:[#allocation3 + $0xe8c] ss:$16 sps:$4 sm:$0xff]   ;;  %v5710_v14 = vld [vmem:[#allocation3 + $0xe80] ss:$16 sps:$4 sm:$0xff]  }
 0x1d1   :  { %3504 = vmatpush1.bf16.msra.mxu0 %v5626_v15  ;;  %3832 = vmatpush1.bf16.msra.mxu1 %v5629_v16  ;;  %v5713_v15 = vld [vmem:[#allocation3 + $0xe88] ss:$16 sps:$4 sm:$0xff]   ;;  %v5718_v16 = vld [vmem:[#allocation3 + $0xea4] ss:$16 sps:$4 sm:$0xff]  }
 0x1d2   :  { %3505 = vmatprep.subr.bf16.mxu0 %v5634_v17  ;;  %3833 = vmatprep.subr.bf16.mxu1 %v5637_v18  ;;  %v5721_v17 = vld [vmem:[#allocation3 + $0xeac] ss:$16 sps:$4 sm:$0xff]   ;;  %v5716_v18 = vld [vmem:[#allocation3 + $0xea0] ss:$16 sps:$4 sm:$0xff]  }
 0x1d5   :  { %3506 = vmatpush1.bf16.msra.mxu0 %v5632_v19  ;;  %3834 = vmatpush1.bf16.msra.mxu1 %v5635_v20  ;;  %v5719_v19 = vld [vmem:[#allocation3 + $0xea8] ss:$16 sps:$4 sm:$0xff]   ;;  %v5724_v20 = vld [vmem:[#allocation3 + $0xec4] ss:$16 sps:$4 sm:$0xff]  }
 0x1d6   :  { %3507 = vmatprep.subr.bf16.mxu0 %v5640_v21  ;;  %3835 = vmatprep.subr.bf16.mxu1 %v5643_v22  ;;  %v5727_v21 = vld [vmem:[#allocation3 + $0xecc] ss:$16 sps:$4 sm:$0xff]   ;;  %v5722_v22 = vld [vmem:[#allocation3 + $0xec0] ss:$16 sps:$4 sm:$0xff]  }
 0x1d9   :  { %3508 = vmatpush1.bf16.msra.mxu0 %v5638_v24  ;;  %3836 = vmatpush1.bf16.msra.mxu1 %v5641_v9  ;;  %v5725_v24 = vld [vmem:[#allocation3 + $0xec8] ss:$16 sps:$4 sm:$0xff]   ;;  %v5730_v9 = vld [vmem:[#allocation3 + $0xee4] ss:$16 sps:$4 sm:$0xff]  }
 0x1da   :  { %3509 = vmatprep.subr.bf16.mxu0 %v5646_v27  ;;  %3837 = vmatprep.subr.bf16.mxu1 %v5649_v28  ;;  %v5733_v27 = vld [vmem:[#allocation3 + $0xeec] ss:$16 sps:$4 sm:$0xff]   ;;  %v5728_v28 = vld [vmem:[#allocation3 + $0xee0] ss:$16 sps:$4 sm:$0xff]  }
 0x1dd   :  { %3510 = vmatpush1.bf16.msra.mxu0 %v5644_v23  ;;  %3838 = vmatpush1.bf16.msra.mxu1 %v5647_v30  ;;  %v5731_v23 = vld [vmem:[#allocation3 + $0xee8] ss:$16 sps:$4 sm:$0xff]   ;;  %v5736_v30 = vld [vmem:[#allocation3 + $0xf04] ss:$16 sps:$4 sm:$0xff]  }
 0x1de   :  { %3511 = vmatprep.subr.bf16.mxu0 %v5652_v31  ;;  %3839 = vmatprep.subr.bf16.mxu1 %v5655_v33  ;;  %v5739_v31 = vld [vmem:[#allocation3 + $0xf0c] ss:$16 sps:$4 sm:$0xff]   ;;  %v5734_v33 = vld [vmem:[#allocation3 + $0xf00] ss:$16 sps:$4 sm:$0xff]  }
 0x1e1   :  { %3512 = vmatpush1.bf16.msra.mxu0 %v5650_v34  ;;  %3840 = vmatpush1.bf16.msra.mxu1 %v5653_v35  ;;  %v5737_v34 = vld [vmem:[#allocation3 + $0xf08] ss:$16 sps:$4 sm:$0xff]   ;;  %v5742_v35 = vld [vmem:[#allocation3 + $0xf24] ss:$16 sps:$4 sm:$0xff]  }
 0x1e2   :  { %3513 = vmatprep.subr.bf16.mxu0 %v5658_v36  ;;  %3841 = vmatprep.subr.bf16.mxu1 %v5661_v37  ;;  %v5745_v36 = vld [vmem:[#allocation3 + $0xf2c] ss:$16 sps:$4 sm:$0xff]   ;;  %v5740_v37 = vld [vmem:[#allocation3 + $0xf20] ss:$16 sps:$4 sm:$0xff]  }
 0x1e5   :  { %3514 = vmatpush1.bf16.msra.mxu0 %v5656_v38  ;;  %3842 = vmatpush1.bf16.msra.mxu1 %v5659_v39  ;;  %v5743_v38 = vld [vmem:[#allocation3 + $0xf28] ss:$16 sps:$4 sm:$0xff]   ;;  %v5748_v39 = vld [vmem:[#allocation3 + $0xf44] ss:$16 sps:$4 sm:$0xff]  }
 0x1e6   :  { %3515 = vmatprep.subr.bf16.mxu0 %v5664_v26  ;;  %3843 = vmatprep.subr.bf16.mxu1 %v5667_v41  ;;  %v5751_v26 = vld [vmem:[#allocation3 + $0xf4c] ss:$16 sps:$4 sm:$0xff]   ;;  %v5746_v41 = vld [vmem:[#allocation3 + $0xf40] ss:$16 sps:$4 sm:$0xff]  }
 0x1e9   :  { %3516 = vmatpush1.bf16.msra.mxu0 %v5662_v42  ;;  %3844 = vmatpush1.bf16.msra.mxu1 %v5665_v45  ;;  %v5749_v42 = vld [vmem:[#allocation3 + $0xf48] ss:$16 sps:$4 sm:$0xff]   ;;  %v5754_v45 = vld [vmem:[#allocation3 + $0xf64] ss:$16 sps:$4 sm:$0xff]  }
 0x1ea   :  { %3517 = vmatprep.subr.bf16.mxu0 %v5670_v29  ;;  %3845 = vmatprep.subr.bf16.mxu1 %v5673_v46  ;;  %v5757_v29 = vld [vmem:[#allocation3 + $0xf6c] ss:$16 sps:$4 sm:$0xff]   ;;  %v5752_v46 = vld [vmem:[#allocation3 + $0xf60] ss:$16 sps:$4 sm:$0xff]  }
 0x1ed   :  { %3518 = vmatpush1.bf16.msra.mxu0 %v5668_v47  ;;  %3846 = vmatpush1.bf16.msra.mxu1 %v5671_v48  ;;  %v5755_v47 = vld [vmem:[#allocation3 + $0xf68] ss:$16 sps:$4 sm:$0xff]   ;;  %v5760_v48 = vld [vmem:[#allocation3 + $0xf84] ss:$16 sps:$4 sm:$0xff]  }
 0x1ee   :  { %3519 = vmatprep.subr.bf16.mxu0 %v5676_v50  ;;  %3847 = vmatprep.subr.bf16.mxu1 %v5679_v51  ;;  %v5763_v50 = vld [vmem:[#allocation3 + $0xf8c] ss:$16 sps:$4 sm:$0xff]   ;;  %v5758_v51 = vld [vmem:[#allocation3 + $0xf80] ss:$16 sps:$4 sm:$0xff]  }
 0x1f1   :  { %3520 = vmatpush1.bf16.msra.mxu0 %v5674_v53  ;;  %3848 = vmatpush1.bf16.msra.mxu1 %v5677_v54  ;;  %v5766_v53 = vld [vmem:[#allocation3 + $0xfa4] ss:$16 sps:$4 sm:$0xff]   ;;  %v5769_v54 = vld [vmem:[#allocation3 + $0xfac] ss:$16 sps:$4 sm:$0xff]  }
 0x1f2   :  { %3521 = vmatprep.subr.bf16.mxu0 %v5682_v55  ;;  %3849 = vmatprep.subr.bf16.mxu1 %v5685_v32  ;;  %v5764_v55 = vld [vmem:[#allocation3 + $0xfa0] ss:$16 sps:$4 sm:$0xff]   ;;  %v5767_v32 = vld [vmem:[#allocation3 + $0xfa8] ss:$16 sps:$4 sm:$0xff]  }
 0x1f5   :  { %3522 = vmatpush1.bf16.msra.mxu0 %v5680_v57  ;;  %3850 = vmatpush1.bf16.msra.mxu1 %v5683_v58  ;;  %v5772_v57 = vld [vmem:[#allocation3 + $0xfc4] ss:$16 sps:$4 sm:$0xff]   ;;  %v5775_v58 = vld [vmem:[#allocation3 + $0xfcc] ss:$16 sps:$4 sm:$0xff]  }
 0x1f6   :  { %3532 = vmatprep.subr.bf16.mxu0 %v5688_v59  ;;  %3860 = vmatprep.subr.bf16.mxu1 %v5691_v60  ;;  %v5770_v59 = vld [vmem:[#allocation3 + $0xfc0] ss:$16 sps:$4 sm:$0xff]   ;;  %v5773_v60 = vld [vmem:[#allocation3 + $0xfc8] ss:$16 sps:$4 sm:$0xff]  }
 0x1f8   :  { %3524 = vmatmul.mubr.bf16.vlgmr.msra.gmra.mrb[0].mxu0 %v169_v61  ;;  %3852 = vmatmul.mubr.bf16.vlgmr.msra.gmra.mrb[0].mxu1 %v169_v61  ;;  %v5781_v61 = vld [vmem:[#allocation3 + $0xfec] ss:$16 sps:$4 sm:$0xff]  }
 0x1f9   :  { %3533 = vmatpush1.bf16.msra.mxu0 %v5686_v62  ;;  %3861 = vmatpush1.bf16.msra.mxu1 %v5689_v40  ;;  %v5776_v62 = vld [vmem:[#allocation3 + $0xfe0] ss:$16 sps:$4 sm:$0xff]   ;;  %v5779_v40 = vld [vmem:[#allocation3 + $0xfe8] ss:$16 sps:$4 sm:$0xff]  }
 0x1fa   :  { %3534 = vmatprep.subr.bf16.mxu0 %v5694_v63  ;;  %3862 = vmatprep.subr.bf16.mxu1 %v5697_v0  ;;  %v5783_v63 = vld [vmem:[%s6192_s3 + $0x40] sm:$0xff]  }
 0x1fb   :  { %3564 = vmatprep.mubr.bf16.mxu0 %v172_v1  ;;  %3892 = vmatprep.mubr.bf16.mxu1 %v172_v1  ;;  %v5785_v0 = vld [vmem:[%s6192_s3 + $0xc0] sm:$0xff]   ;;  %v171_v1 = vpack.c.bf16 %v6063_v56, %v6063_v56  ;;  %v5789_v56 = vld [vmem:[%s6192_s3 + $0xc8] sm:$0xff]  }
 0x1fd   :  { %3535 = vmatpush1.bf16.msra.mxu0 %v5692_v2  ;;  %3863 = vmatpush1.bf16.msra.mxu1 %v5695_v3  ;;  %v5784_v2 = vld [vmem:[%s6192_s3] sm:$0xff]  }
 0x1fe   :  { %3536 = vmatprep.subr.bf16.mxu0 %v5700_v4  ;;  %3864 = vmatprep.subr.bf16.mxu1 %v5703_v5  ;;  %v5786_v3 = vld [vmem:[%s6192_s3 + $0x80] sm:$0xff]   ;;  %v5787_v4 = vld [vmem:[%s6192_s3 + $0x48] sm:$0xff]  }
 0x1ff   :  { %v5788_v5 = vld [vmem:[%s6192_s3 + $0x8] sm:$0xff]  }
 0x201   :  { %3537 = vmatpush1.bf16.msra.mxu0 %v5698_v25  ;;  %3865 = vmatpush1.bf16.msra.mxu1 %v5701_v6  ;;  %v5790_v25 = vld [vmem:[%s6192_s3 + $0x88] sm:$0xff]   ;;  %v5791_v6 = vld [vmem:[%s6192_s3 + $0x50] sm:$0xff]  }
 0x202   :  { %3538 = vmatprep.subr.bf16.mxu0 %v5706_v7  ;;  %3866 = vmatprep.subr.bf16.mxu1 %v5709_v8  ;;  %v5793_v7 = vld [vmem:[%s6192_s3 + $0xd0] sm:$0xff]  }
 0x203   :  { %v5792_v8 = vld [vmem:[%s6192_s3 + $0x10] sm:$0xff]  }
 0x205   :  { %3539 = vmatpush1.bf16.msra.mxu0 %v5704_v10  ;;  %3867 = vmatpush1.bf16.msra.mxu1 %v5707_v11  ;;  %v5794_v10 = vld [vmem:[%s6192_s3 + $0x90] sm:$0xff]   ;;  %v5795_v11 = vld [vmem:[%s6192_s3 + $0x58] sm:$0xff]  }
 0x206   :  { %3540 = vmatprep.subr.bf16.mxu0 %v5712_v12  ;;  %3868 = vmatprep.subr.bf16.mxu1 %v5715_v13  ;;  %v5796_v12 = vld [vmem:[%s6192_s3 + $0x18] sm:$0xff]  }
 0x207   :  { %v5797_v13 = vld [vmem:[%s6192_s3 + $0xd8] sm:$0xff]  }
 0x209   :  { %3541 = vmatpush1.bf16.msra.mxu0 %v5710_v14  ;;  %3869 = vmatpush1.bf16.msra.mxu1 %v5713_v15  ;;  %v5798_v14 = vld [vmem:[%s6192_s3 + $0x98] sm:$0xff]   ;;  %v5799_v15 = vld [vmem:[%s6192_s3 + $0x60] sm:$0xff]  }
 0x20a   :  { %3542 = vmatprep.subr.bf16.mxu0 %v5718_v16  ;;  %3870 = vmatprep.subr.bf16.mxu1 %v5721_v17  ;;  %v5800_v16 = vld [vmem:[%s6192_s3 + $0x20] sm:$0xff]  }
 0x20b   :  { %v5801_v17 = vld [vmem:[%s6192_s3 + $0xe0] sm:$0xff]  }
 0x20d   :  { %3543 = vmatpush1.bf16.msra.mxu0 %v5716_v18  ;;  %3871 = vmatpush1.bf16.msra.mxu1 %v5719_v19  ;;  %v5802_v18 = vld [vmem:[%s6192_s3 + $0xa0] sm:$0xff]   ;;  %v5803_v19 = vld [vmem:[%s6192_s3 + $0x68] sm:$0xff]  }
 0x20e   :  { %3544 = vmatprep.subr.bf16.mxu0 %v5724_v20  ;;  %3872 = vmatprep.subr.bf16.mxu1 %v5727_v21  ;;  %v5804_v20 = vld [vmem:[%s6192_s3 + $0x28] sm:$0xff]  }
 0x20f   :  { %v5805_v21 = vld [vmem:[%s6192_s3 + $0xe8] sm:$0xff]  }
 0x211   :  { %3545 = vmatpush1.bf16.msra.mxu0 %v5722_v22  ;;  %3873 = vmatpush1.bf16.msra.mxu1 %v5725_v24  ;;  %v5806_v22 = vld [vmem:[%s6192_s3 + $0xa8] sm:$0xff]   ;;  %v5807_v24 = vld [vmem:[%s6192_s3 + $0x70] sm:$0xff]  }
 0x212   :  { %3546 = vmatprep.subr.bf16.mxu0 %v5730_v9  ;;  %3874 = vmatprep.subr.bf16.mxu1 %v5733_v27  ;;  %v5808_v9 = vld [vmem:[%s6192_s3 + $0x30] sm:$0xff]  }
 0x213   :  { %v5809_v27 = vld [vmem:[%s6192_s3 + $0xf0] sm:$0xff]  }
 0x215   :  { %3547 = vmatpush1.bf16.msra.mxu0 %v5728_v28  ;;  %3875 = vmatpush1.bf16.msra.mxu1 %v5731_v23  ;;  %v5810_v28 = vld [vmem:[%s6192_s3 + $0xb0] sm:$0xff]   ;;  %v5811_v23 = vld [vmem:[%s6192_s3 + $0x78] sm:$0xff]  }
 0x216   :  { %3548 = vmatprep.subr.bf16.mxu0 %v5736_v30  ;;  %3876 = vmatprep.subr.bf16.mxu1 %v5739_v31  ;;  %v5813_v30 = vld [vmem:[%s6192_s3 + $0xf8] sm:$0xff]  }
 0x217   :  { %v5812_v31 = vld [vmem:[%s6192_s3 + $0x38] sm:$0xff]  }
 0x219   :  { %3549 = vmatpush1.bf16.msra.mxu0 %v5734_v33  ;;  %3877 = vmatpush1.bf16.msra.mxu1 %v5737_v34  ;;  %v5814_v33 = vld [vmem:[%s6192_s3 + $0xb8] sm:$0xff]   ;;  %v3933_v34 = vsub.s32 0, %v5989_v43  ;;  %s5915_s3 = smov [#allocation9]  }
 0x21a   :  { %3550 = vmatprep.subr.bf16.mxu0 %v5742_v35  ;;  %3878 = vmatprep.subr.bf16.mxu1 %v5745_v36  ;;  %v3937_v35 = vsub.s32 1, %v5989_v43  ;;  %v3941_v36 = vsub.s32 2, %v5989_v43  ;;  %s4349_s16 = sshll.u32 %s5915_s3, 4  ;;  %s4350_s16 = int_to_ptr.vmem [resolvable:$true] %s4349_s16 }
 0x21b   :  { %s5881_s17 = scalar_lea.vmem %s4350_s16, 32  ;;  %p5886_p11 = scmp.lt.s32.totalorder %s4350_s16, %s4350_s16 }
 0x21c   :  { %p5882_p10 = scmp.ne.s32.totalorder %s4350_s16, %s5881_s17  ;;  %p5887_p12 = scmp.lt.s32.totalorder %s5881_s17, %s5881_s17 }
 0x21d   :  { %3551 = vmatpush1.bf16.msra.mxu0 %v5740_v37  ;;  %3879 = vmatpush1.bf16.msra.mxu1 %v5743_v38  ;;  %v3945_v37 = vsub.s32 3, %v5989_v43  ;;  %v3929_v38 = vld [vmem:[#allocation6] sm:$0xf] }
 0x21e   :  { %3552 = vmatprep.subr.bf16.mxu0 %v5748_v39  ;;  %3880 = vmatprep.subr.bf16.mxu1 %v5751_v26  ;;  %v3934_v39 = vrot.slane %v3929_v38, %v3933_v34  ;;  %v3938_v26 = vrot.slane %v3929_v38, %v3937_v35  ;;  %p5888_p13 = por %p5887_p12, %p5886_p11 }
 0x220   :  { %p5889_p0 = pnand %p5888_p13, %p5882_p10 }
 0x221   :  { %3553 = vmatpush1.bf16.msra.mxu0 %v5746_v41  ;;  %3881 = vmatpush1.bf16.msra.mxu1 %v5749_v42  ;;  %v3942_v41 = vrot.slane %v3929_v38, %v3941_v36  ;;  %v3946_v42 = vrot.slane %v3929_v38, %v3945_v37 }
 0x222   :  { %3554 = vmatprep.subr.bf16.mxu0 %v5754_v45  ;;  %3882 = vmatprep.subr.bf16.mxu1 %v5757_v29  ;;  %v3947_v45 = vcombine.low %v3934_v39, %v3938_v26 }
 0x223   :  { %v3948_v29 = vcombine.low %v3942_v41, %v3946_v42 }
 0x225   :  { %3555 = vmatpush1.bf16.msra.mxu0 %v5752_v46  ;;  %3883 = vmatpush1.bf16.msra.mxu1 %v5755_v47 }
 0x226   :  { %3556 = vmatprep.subr.bf16.mxu0 %v5760_v48  ;;  %3884 = vmatprep.subr.bf16.mxu1 %v5763_v50  ;;  %v3955_v48 = vrot.slane %v3947_v45, %v5992_v49  ;;  %v3962_v50 = vrot.slane %v3948_v29, %v5992_v49 }
 0x229   :  { %3557 = vmatpush1.bf16.msra.mxu0 %v5758_v51  ;;  %3885 = vmatpush1.bf16.msra.mxu1 %v5761_v52 }
 0x22a   :  { %3558 = vmatprep.subr.bf16.mxu0 %v5766_v53  ;;  %3886 = vmatprep.subr.bf16.mxu1 %v5769_v54 }
 0x22d   :  { %3559 = vmatpush1.bf16.msra.mxu0 %v5764_v55  ;;  %3887 = vmatpush1.bf16.msra.mxu1 %v5767_v32 }
 0x22e   :  { %3560 = vmatprep.subr.bf16.mxu0 %v5772_v57  ;;  %3888 = vmatprep.subr.bf16.mxu1 %v5775_v58 }
 0x231   :  { %3561 = vmatpush1.bf16.msra.mxu0 %v5770_v59  ;;  %3889 = vmatpush1.bf16.msra.mxu1 %v5773_v60  ;;  %v3963_v60 = vcombine.low %v3955_v48, %v3962_v50 }
 0x232   :  { %3562 = vmatprep.subr.bf16.mxu0 %v5778_v44  ;;  %3890 = vmatprep.subr.bf16.mxu1 %v5781_v61 }
 0x235   :  { %3563 = vmatpush1.bf16.msra.mxu0 %v5776_v62  ;;  %3891 = vmatpush1.bf16.msra.mxu1 %v5779_v40 }
 0x236   :  { %4904 = vmatprep.subr.bf16.mxu0 %v5783_v63  ;;  %4926 = vmatprep.subr.bf16.mxu1 %v5785_v0 }
 0x238   :  { %3565 = vmatmul.mubr.bf16.vlgmr.msra.gmra.mrb[0].mxu0 %v171_v1  ;;  %3893 = vmatmul.mubr.bf16.vlgmr.msra.gmra.mrb[0].mxu1 %v171_v1 }
 0x239   :  { %4905 = vmatpush3.bf16.msra.mxu0 %v5784_v2  ;;  %4927 = vmatpush3.bf16.msra.mxu1 %v5786_v3 }
 0x23a   :  { %4906 = vmatprep.subr.bf16.mxu0 %v5787_v4  ;;  %4928 = vmatprep.subr.bf16.mxu1 %v5789_v56 }
 0x23d   :  { %4907 = vmatpush3.bf16.msra.mxu0 %v5788_v5  ;;  %4929 = vmatpush3.bf16.msra.mxu1 %v5790_v25 }
 0x23e   :  { %4908 = vmatprep.subr.bf16.mxu0 %v5791_v6  ;;  %4930 = vmatprep.subr.bf16.mxu1 %v5793_v7  ;;  %v4871_v6 = vld [vmem:[#allocation8] ss:$0 sm:$0xff] }
 0x241   :  { %4909 = vmatpush3.bf16.msra.mxu0 %v5792_v8  ;;  %4931 = vmatpush3.bf16.msra.mxu1 %v5794_v10 }
 0x242   :  { %4910 = vmatprep.subr.bf16.mxu0 %v5795_v11  ;;  %4932 = vmatprep.subr.bf16.mxu1 %v5797_v13 }
 0x245   :  { %4911 = vmatpush3.bf16.msra.mxu0 %v5796_v12  ;;  %4933 = vmatpush3.bf16.msra.mxu1 %v5798_v14 }
 0x246   :  { %4912 = vmatprep.subr.bf16.mxu0 %v5799_v15  ;;  %4934 = vmatprep.subr.bf16.mxu1 %v5801_v17 }
 0x249   :  { %4913 = vmatpush3.bf16.msra.mxu0 %v5800_v16  ;;  %4935 = vmatpush3.bf16.msra.mxu1 %v5802_v18 }
 0x24a   :  { %4914 = vmatprep.subr.bf16.mxu0 %v5803_v19  ;;  %4936 = vmatprep.subr.bf16.mxu1 %v5805_v21 }
 0x24d   :  { %4915 = vmatpush3.bf16.msra.mxu0 %v5804_v20  ;;  %4937 = vmatpush3.bf16.msra.mxu1 %v5806_v22 }
 0x24e   :  { %4916 = vmatprep.subr.bf16.mxu0 %v5807_v24  ;;  %4938 = vmatprep.subr.bf16.mxu1 %v5809_v27 }
 0x251   :  { %4917 = vmatpush3.bf16.msra.mxu0 %v5808_v9  ;;  %4939 = vmatpush3.bf16.msra.mxu1 %v5810_v28 }
 0x252   :  { %4918 = vmatprep.subr.bf16.mxu0 %v5811_v23  ;;  %4940 = vmatprep.subr.bf16.mxu1 %v5813_v30 }
 0x255   :  { %4919 = vmatpush3.bf16.msra.mxu0 %v5812_v31  ;;  %4941 = vmatpush3.bf16.msra.mxu1 %v5814_v33 }
 0x30b   :  { %v3566_v46 = vpop.f32.mrb[0].mxu0  ;;  %v3894_v47 = vpop.f32.mrb[0].mxu1 }
 0x30c   :  { %v3568_v51 = vpop.f32.mrb[1].mxu0  ;;  %v3896_v52 = vpop.f32.mrb[1].mxu1 }
 0x30d   :  { %v3905_v53 = vcombine.low %v3566_v46, %v3568_v51  ;;  %v3906_v54 = vcombine.low %v3894_v47, %v3896_v52  ;;  %v3570_v55 = vpop.f32.mrb[2].mxu0  ;;  %v3898_v32 = vpop.f32.mrb[2].mxu1 }
 0x30e   :  { %v3571_v43 = vpop.f32.mrb[3].mxu0  ;;  %v3899_v57 = vpop.f32.mrb[3].mxu1 }
 0x30f   :  { %v3913_v58 = vrot.slane %v3905_v53, %v5992_v49  ;;  %v3920_v59 = vrot.slane %v3906_v54, %v5992_v49 }
 0x311   :  { %v3921_v44 = vcombine.low %v3913_v58, %v3920_v59 }
 0x313   :  { %v3965_v61 = vadd.f32 %v3963_v60, %v3921_v44 }
 0x315   :  { %v3966_v62 = vmax.f32 %v3965_v61, 0.0 }
 0x317   :  { %v3975_v40 = vrot.slane %v3966_v62, %v5992_v49  ;;  %v3968_v63 = vcombine.high %v3966_v62, %v3966_v62 }
 0x319   :  { %v3983_v0 = vcombine.high %v3975_v40, %v3975_v40  ;;  %v3982_v1 = vrot.slane %v3968_v63, %v5992_v49  ;;  %v3989_v4 = vpack.c.bf16 %v3975_v40, %v3975_v40 }
 0x31b   :  { %v3990_v2 = vpack.c.bf16 %v3983_v0, %v3983_v0  ;;  %v3984_v3 = vcombine.high %v3982_v1, %v3982_v1  ;;  %v3991_v5 = vpack.c.bf16 %v3982_v1, %v3982_v1 }
 0x31d   :  { %4293 = vmatprep.mubr.bf16.mxu0 %v3990_v2  ;;  %v3992_v56 = vpack.c.bf16 %v3984_v3, %v3984_v3 }
 0x31e   :  { %4294 = vmatmul.mubr.bf16.vlgmr.msra.gmra.mrb[4].mxu0 %v3989_v4 }
 0x31f   :  { %4333 = vmatprep.mubr.bf16.mxu1 %v3992_v56 }
 0x320   :  { %4334 = vmatmul.mubr.bf16.vlgmr.msra.gmra.mrb[4].mxu1 %v3991_v5 }
 0x3f1   :  { %v4920_v25 = vpop.f32.mrb[4].mxu0 }
 0x3f2   :  { %v4921_v7 = vpop.f32.mrb[5].mxu0 }
 0x3f3   :  { %v4922_v8 = vadd.f32 %v4921_v7, %v4920_v25  ;;  %v4923_v10 = vpop.f32.mrb[6].mxu0  ;;  %v4942_v11 = vpop.f32.mrb[4].mxu1 }
 0x3f4   :  { %v4924_v12 = vpop.f32.mrb[7].mxu0  ;;  %v4943_v13 = vpop.f32.mrb[5].mxu1 }
 0x3f5   :  { %v4296_v49 = vadd.f32 %v4922_v8, %v4871_v6  ;;  %v4944_v14 = vadd.f32 %v4943_v13, %v4942_v11  ;;  %v4945_v15 = vpop.f32.mrb[6].mxu1 }
 0x3f6   :  { %v4946_v16 = vpop.f32.mrb[7].mxu1 }
 0x3f7   :  { %v4336_v17 = vadd.f32 %v4944_v14, %v4296_v49 }
 0x3f9   :  { %4342 = vst.msk [vmem:[#allocation9] sm:$0x3] %vm4341_vm0, %v4336_v17 }
 0x3fa   :  { %5892 = shalt.err (!%p5889_p0)
}
 0x3fb   :  { %s5893_s20 = scalar_lea.hbm %s6194_s5, 32 }
 0x3fc   :  { %p5894_p1 = scmp.ne.s32.totalorder %s6194_s5, %s5893_s20  ;;  %p5897_p2 = scmp.lt.u32.totalorder %s5893_s20, %s6194_s5 }
 0x3fe   :  { %p5899_p3 = pnand %p5897_p2, %p5894_p1 }
 0x400   :  { %5902 = shalt.err (!%p5899_p3)
}
 0x401   :  { %4352 = dma.vmem_to_hbm [thread:$0]  %s4350_s16, 32, %s6194_s5, [#allocation5]  }
 0x402   :  { %5907 = dma.done.wait [#allocation5], 32  }
 0x403   :  { %5908 = vsyncadd [#allocation5], 4294967264 }
 0x404   :  { %4356 = vsyncpa [#allocation4], 1 }
 0x405   :  { %4357 = vsyncpa [#allocation7], 1 }
 0x406   :  { %4358 = vsyncpa [#allocation5], 1 }

</bundles_post_ra>
